<compile_context>
chip_gen: v7x
topology: tpu7x:2x2x1
jax: 0.10.0
libtpu: 0.0.40
codegen_flags: <defaults>
</compile_context>

<pallas_src>
import functools

import jax
import jax.numpy as jnp
from jax.experimental import pallas as pl
from jax.experimental.pallas import tpu as pltpu

# ---------------- synthetic settings ----------------
EMBEDDED_FEATURE_SIZE = 32
NOTE_EMBEDDING_FEATURE_SIZE = 16
TIME_EMBEDDING_LAYER_KERNEL = [2, 2]
NOTE_ORIGINAL_FEATURE_SIZE = 4
NOTE_FEATURE_SUMMARY_LAYER_FEATURE = [8]
N_VELOCITY = 8   # MidiPianoRoll.sliceVelocity() -> slice(0, 8)
N_CONTROL = 8    # MidiPianoRoll.sliceControl() -> slice(8, 16)

DTYPE = jnp.float32
MAX_LANE_TILE = 1024   # conservative for v7x's 64 MiB VMEM; fine on v5e/v6e too


# ---------------- activations (usable in-kernel and in the JAX reference) ----
def _hardswish(x):
    return x * jnp.clip(x + 3.0, 0.0, 6.0) * (1.0 / 6.0)


def _mish(x):
    sp = jnp.log1p(jnp.exp(-jnp.abs(x))) + jnp.maximum(x, 0.0)  # stable softplus
    return x * jnp.tanh(sp)


def _hardtanh(x):
    return jnp.clip(x, -1.0, 1.0)


# ---------------- fused Pallas kernel ----------------
def _fused_kernel(x_ref, w1_ref, b1_ref, w2_ref, b2_ref,
                  wp1_ref, bp1_ref, wp2_ref, bp2_ref, wp3_ref, bp3_ref,
                  o_ref, *, tn, w_time, kt, cout2, n_vel, split):
    # x_ref block: (1, Cin, TN) -- channels on sublanes, (note,time) on lanes.
    x = x_ref[0]                                                       # (Cin, TN)

    # ConvTranspose layer 1 (+Hardswish): rows are (j1, cout1) k-major.
    h1 = jnp.dot(w1_ref[...], x, preferred_element_type=jnp.float32) + b1_ref[...]
    h1 = _hardswish(h1)                                                # (k1*Cout1, TN)

    # ConvTranspose layer 2 (+Hardswish) via block-diagonal weight:
    # rows are t_local*Cout2 + c2 with t_local = j1*k2 + j2.
    h2 = jnp.dot(w2_ref[...], h1, preferred_element_type=jnp.float32) + b2_ref[...]
    h2 = _hardswish(h2)                                                # (kt*Cout2, TN)

    def load_head(i):
        # Hoisted weight loads (shared by all kt time-expansion rows).
        return (wp1_ref[i], bp1_ref[i], wp2_ref[i], bp2_ref[i], wp3_ref[i], bp3_ref[i])

    def head(feat, hp):
        # Linear(16,4) -> Softmax -> Linear(4,8) -> Mish -> Linear(8,1) -> Hardtanh
        w1h, b1h, w2h, b2h, w3h, b3h = hp
        a1 = jnp.dot(w1h, feat, preferred_element_type=jnp.float32) + b1h
        a1 = a1 - jnp.max(a1, axis=0, keepdims=True)
        e = jnp.exp(a1)
        p = e / jnp.sum(e, axis=0, keepdims=True)                      # (4, TN)
        a2 = _mish(jnp.dot(w2h, p, preferred_element_type=jnp.float32) + b2h)
        a3 = jnp.sum(a2 * w3h, axis=0, keepdims=True) + b3h            # VPU 8->1
        return _hardtanh(a3)                                           # (1, TN)

    rows = []
    if split:
        # Pure tile: BlockSpec index_map already selected the right head's
        # weights (block (1, ...)) via the head grid axis -> single head eval.
        hp = load_head(0)
        for t in range(kt):
            rows.append(head(h2[t * cout2:(t + 1) * cout2, :], hp))
    else:
        # Mixed tile: velocity head iff lane = note*W + w satisfies note < n_vel.
        hv, hc = load_head(0), load_head(1)
        lane = jax.lax.broadcasted_iota(jnp.int32, (1, tn), 1) + pl.program_id(1) * tn
        is_vel = lane < (n_vel * w_time)                               # (1, TN)
        for t in range(kt):
            feat = h2[t * cout2:(t + 1) * cout2, :]
            rows.append(jnp.where(is_vel, head(feat, hv), head(feat, hc)))

    o_ref[0] = jnp.concatenate(rows, axis=0).astype(o_ref.dtype)       # (kt, TN)


# ---------------- tiling / spec helpers ----------------
def _pick_lane_tile(hw, max_tile=MAX_LANE_TILE):
    """Largest lane tile <= max_tile that is a multiple of 128 and divides hw,
    or the whole axis if hw is small / has no such divisor."""
    if hw <= max_tile:
        return hw
    t = (max_tile // 128) * 128
    while t >= 128:
        if hw % t == 0:
            return t
        t -= 128
    return hw


def _pick_aligned_tile(n, max_tile=MAX_LANE_TILE):
    """Largest multiple of 128 <= max_tile dividing n (requires n % 128 == 0)."""
    t = (min(n, max_tile) // 128) * 128
    while t >= 128:
        if n % t == 0:
            return t
        t -= 128
    return 128


def _const_spec2(arr):
    nd = arr.ndim
    return pl.BlockSpec(arr.shape, lambda b, j, _nd=nd: (0,) * _nd)


def _const_spec3(arr):
    nd = arr.ndim
    return pl.BlockSpec(arr.shape, lambda b, g, j, _nd=nd: (0,) * _nd)


def _head_spec3(arr):
    # Select the head (velocity=0 / control=1) block purely via the grid index.
    return pl.BlockSpec((1,) + arr.shape[1:], lambda b, g, j: (g, 0, 0))


# ---------------- wrapper ----------------
def time_step_expansion_forward(x, params):
    """x: (B, EMBEDDED_FEATURE_SIZE, H_notes, W_time) -> (B, T_expanded, H_notes)."""
    B, cin, H, W = x.shape
    (w1, b1), (w2, b2) = params["time_expansion"]
    k1, k2 = TIME_EMBEDDING_LAYER_KERNEL
    cout1, cout2 = w1.shape[1], w2.shape[1]
    kt = k1 * k2
    hw = H * W

    # Conv weights: k-major / cout-minor rows, lanes-on-columns orientation.
    w1t = jnp.transpose(w1, (2, 1, 0)).reshape(k1 * cout1, cin)         # (48, 32)
    b1t = jnp.tile(b1, k1).reshape(k1 * cout1, 1)                       # k-major tile
    w2t = jnp.transpose(w2, (2, 1, 0)).reshape(k2 * cout2, cout1)       # (32, 24)
    w2bd = jnp.kron(jnp.eye(k1, dtype=DTYPE), w2t)                      # (64, 48) block-diag
    b2t = jnp.tile(b2, kt).reshape(kt * cout2, 1)

    # Projection heads stacked: index 0 = velocity, 1 = control.
    pv, pc = params["vel"], params["ctrl"]
    wp1 = jnp.stack([pv[0].T, pc[0].T])                                 # (2, 4, 16)
    bp1 = jnp.stack([pv[1].reshape(-1, 1), pc[1].reshape(-1, 1)])       # (2, 4, 1)
    wp2 = jnp.stack([pv[2].T, pc[2].T])                                 # (2, 8, 4)
    bp2 = jnp.stack([pv[3].reshape(-1, 1), pc[3].reshape(-1, 1)])       # (2, 8, 1)
    wp3 = jnp.stack([pv[4], pc[4]])                                     # (2, 8, 1)
    bp3 = jnp.stack([pv[5].reshape(1, 1), pc[5].reshape(1, 1)])         # (2, 1, 1)

    x_slab = x.reshape(B, cin, hw)            # contiguous NCHW flatten, no transpose

    # Fast path: each lane tile belongs to exactly one head (128-lane aligned halves).
    half = N_VELOCITY * W
    use_split = (N_VELOCITY == N_CONTROL and H == N_VELOCITY + N_CONTROL
                 and half % 128 == 0)

    p1, p2 = NOTE_ORIGINAL_FEATURE_SIZE, NOTE_FEATURE_SUMMARY_LAYER_FEATURE[0]
    heads_per_lane = 1 if use_split else 2
    cols = B * hw
    cost = pl.CostEstimate(
        flops=2 * cols * (cin * k1 * cout1 + k1 * cout1 * kt * cout2
                          + kt * heads_per_lane * (cout2 * p1 + p1 * p2 + p2)),
        transcendentals=cols * kt * heads_per_lane * (p1 + 3 * p2),
        bytes_accessed=4 * (cols * cin + cols * kt + w1t.size + w2bd.size
                            + wp1.size + wp2.size + wp3.size),
    )

    if use_split:
        tn = _pick_aligned_tile(half)
        nh = half // tn
        grid = (B, 2, nh)
        x_spec = pl.BlockSpec((1, cin, tn), lambda b, g, j: (b, 0, g * nh + j))
        out_spec = pl.BlockSpec((1, kt, tn), lambda b, g, j: (b, 0, g * nh + j))
        in_specs = [x_spec,
                    _const_spec3(w1t), _const_spec3(b1t),
                    _const_spec3(w2bd), _const_spec3(b2t),
                    _head_spec3(wp1), _head_spec3(bp1),
                    _head_spec3(wp2), _head_spec3(bp2),
                    _head_spec3(wp3), _head_spec3(bp3)]
        dims = ("parallel", "parallel", "parallel")
    else:
        tn = _pick_lane_tile(hw)
        grid = (B, hw // tn)
        x_spec = pl.BlockSpec((1, cin, tn), lambda b, j: (b, 0, j))
        out_spec = pl.BlockSpec((1, kt, tn), lambda b, j: (b, 0, j))
        in_specs = [x_spec] + [_const_spec2(a) for a in
                               (w1t, b1t, w2bd, b2t, wp1, bp1, wp2, bp2, wp3, bp3)]
        dims = ("parallel", "parallel")

    kernel = functools.partial(_fused_kernel, tn=tn, w_time=W, kt=kt,
                               cout2=cout2, n_vel=N_VELOCITY, split=use_split)
    out = pl.pallas_call(
        kernel,
        out_shape=jax.ShapeDtypeStruct((B, kt, hw), DTYPE),
        grid=grid,
        in_specs=in_specs,
        out_specs=out_spec,
        compiler_params=pltpu.CompilerParams(dimension_semantics=dims),
        cost_estimate=cost,
    )(x_slab, w1t, b1t, w2bd, b2t, wp1, bp1, wp2, bp2, wp3, bp3)

    # out[b, t_local, h*W + w] -> (B, T, H) with t = w*kt + t_local.
    out = out.reshape(B, kt, H, W)
    out = jnp.transpose(out, (0, 3, 1, 2)).reshape(B, W * kt, H)
    return out


# ---------------- pure-JAX reference (for validation only) ----------------
def _conv_t_ref(x, w, b, k):
    y = jnp.einsum('bihw,iok->bohwk', x, w, precision=jax.lax.Precision.HIGHEST)
    Bn, cout, H, W, _ = y.shape
    return _hardswish(y.reshape(Bn, cout, H, W * k) + b[None, :, None, None])


def _proj_ref(x, p):
    w1, b1, w2, b2, w3, b3 = p
    hp = jax.lax.Precision.HIGHEST
    h = jnp.matmul(x, w1, precision=hp) + b1
    h = jax.nn.softmax(h, axis=-1)
    h = _mish(jnp.matmul(h, w2, precision=hp) + b2)
    h = _hardtanh(jnp.matmul(h, w3, precision=hp) + b3)
    return h[..., 0]


def time_step_expansion_ref(x, params):
    h = x
    for (w, b), k in zip(params["time_expansion"], TIME_EMBEDDING_LAYER_KERNEL):
        h = _conv_t_ref(h, w, b, k)
    h = jnp.swapaxes(h, 1, 3)                      # (B, T, H_notes, F_emb)
    vel = _proj_ref(h[:, :, :N_VELOCITY, :], params["vel"])
    ctrl = _proj_ref(h[:, :, N_VELOCITY:N_VELOCITY + N_CONTROL, :], params["ctrl"])
    return jnp.concatenate([vel, ctrl], axis=2)


# ---------------- synthetic parameter init ----------------
def init_params(key):
    params = {}
    remaining = EMBEDDED_FEATURE_SIZE - NOTE_EMBEDDING_FEATURE_SIZE
    inc = remaining // len(TIME_EMBEDDING_LAYER_KERNEL)
    feats = list(range(NOTE_EMBEDDING_FEATURE_SIZE, EMBEDDED_FEATURE_SIZE + 1, inc))[::-1]
    time_layers = []
    for i in range(len(feats) - 1):
        cin, cout = feats[i], feats[i + 1]
        # kernel list indexed un-reversed, exactly as in the original module
        key, a, c = jax.random.split(key, 3)
        w = jax.random.normal(a, (cin, cout, TIME_EMBEDDING_LAYER_KERNEL[i]), DTYPE) \
            * (1.0 / jnp.sqrt(cin))
        b = jax.random.normal(c, (cout,), DTYPE) * 0.05
        time_layers.append((w, b))
    params["time_expansion"] = time_layers

    summary = [NOTE_ORIGINAL_FEATURE_SIZE] + NOTE_FEATURE_SUMMARY_LAYER_FEATURE + [1]

    def make_proj(key):
        dims = [(NOTE_EMBEDDING_FEATURE_SIZE, NOTE_ORIGINAL_FEATURE_SIZE)]
        dims += [(summary[i], summary[i + 1]) for i in range(len(summary) - 1)]
        ws = []
        for (din, dout) in dims:
            key, a, c = jax.random.split(key, 3)
            w = jax.random.normal(a, (din, dout), DTYPE) * (1.0 / jnp.sqrt(din))
            b = jax.random.normal(c, (1, dout), DTYPE) * 0.05
            ws += [w, b]
        return tuple(ws), key

    params["vel"], key = make_proj(key)
    params["ctrl"], key = make_proj(key)
    return params


if __name__ == "__main__":
    key = jax.random.PRNGKey(0)
    key, kx1, kx2 = jax.random.split(key, 3)
    params = init_params(key)
    fwd = jax.jit(time_step_expansion_forward)

    B, H_notes = 2, N_VELOCITY + N_CONTROL
    # W=4  -> mixed-tile fallback path (per-lane head select)
    # W=16 -> 128-aligned halves -> split-grid fast path (one head per tile)
    for W_time, kx in ((4, kx1), (16, kx2)):
        x = jax.random.normal(kx, (B, EMBEDDED_FEATURE_SIZE, H_notes, W_time), DTYPE)
        out = jax.block_until_ready(fwd(x, params))

        t_expanded = W_time
        for k in TIME_EMBEDDING_LAYER_KERNEL:
            t_expanded *= k
        assert out.shape == (B, t_expanded, H_notes), out.shape
        assert bool(jnp.all(jnp.isfinite(out)))
        assert bool(jnp.all(out >= -1.0)) and bool(jnp.all(out <= 1.0))  # Hardtanh range

        ref = time_step_expansion_ref(x, params)
        err = float(jnp.max(jnp.abs(out - ref)))
        assert err < 2e-2, f"W={W_time}: mismatch vs reference, max abs err = {err}"

    print("KERNEL_OK")
</pallas_src>

<mosaic_0001>
module attributes {stable_mosaic.version = 11 : i64} {
  func.func @_fused_kernel(%arg0: i32, %arg1: i32, %arg2: memref<1x32x64xf32, #tpu.memory_space<vmem>>, %arg3: memref<48x32xf32, #tpu.memory_space<vmem>>, %arg4: memref<48x1xf32, #tpu.memory_space<vmem>>, %arg5: memref<64x48xf32, #tpu.memory_space<vmem>>, %arg6: memref<64x1xf32, #tpu.memory_space<vmem>>, %arg7: memref<2x4x16xf32, #tpu.memory_space<vmem>>, %arg8: memref<2x4x1xf32, #tpu.memory_space<vmem>>, %arg9: memref<2x8x4xf32, #tpu.memory_space<vmem>>, %arg10: memref<2x8x1xf32, #tpu.memory_space<vmem>>, %arg11: memref<2x8x1xf32, #tpu.memory_space<vmem>>, %arg12: memref<2x1x1xf32, #tpu.memory_space<vmem>>, %arg13: memref<1x4x64xf32, #tpu.memory_space<vmem>>) attributes {dimension_semantics = [#tpu.dimension_semantics<parallel>, #tpu.dimension_semantics<parallel>], iteration_bounds = array<i64: 2, 1>, scalar_prefetch = 0 : i64, scratch_operands = 0 : i64, tpu.core_type = #tpu.core_type<tc>, window_params = [{transform_indices = @transform_0, window_bounds = array<i64: 1, 32, 64>}, {pipeline_mode = #tpu.pipeline_mode<synchronous>, transform_indices = @transform_1, window_bounds = array<i64: 48, 32>}, {pipeline_mode = #tpu.pipeline_mode<synchronous>, transform_indices = @transform_2, window_bounds = array<i64: 48, 1>}, {pipeline_mode = #tpu.pipeline_mode<synchronous>, transform_indices = @transform_3, window_bounds = array<i64: 64, 48>}, {pipeline_mode = #tpu.pipeline_mode<synchronous>, transform_indices = @transform_4, window_bounds = array<i64: 64, 1>}, {pipeline_mode = #tpu.pipeline_mode<synchronous>, transform_indices = @transform_5, window_bounds = array<i64: 2, 4, 16>}, {pipeline_mode = #tpu.pipeline_mode<synchronous>, transform_indices = @transform_6, window_bounds = array<i64: 2, 4, 1>}, {pipeline_mode = #tpu.pipeline_mode<synchronous>, transform_indices = @transform_7, window_bounds = array<i64: 2, 8, 4>}, {pipeline_mode = #tpu.pipeline_mode<synchronous>, transform_indices = @transform_8, window_bounds = array<i64: 2, 8, 1>}, {pipeline_mode = #tpu.pipeline_mode<synchronous>, transform_indices = @transform_9, window_bounds = array<i64: 2, 8, 1>}, {pipeline_mode = #tpu.pipeline_mode<synchronous>, transform_indices = @transform_10, window_bounds = array<i64: 2, 1, 1>}, {transform_indices = @transform_11, window_bounds = array<i64: 1, 4, 64>}]} {
    %c0 = arith.constant 0 : index
    %c0_0 = arith.constant 0 : index
    %c0_1 = arith.constant 0 : index
    %0 = vector.load %arg2[%c0, %c0_0, %c0_1] : memref<1x32x64xf32, #tpu.memory_space<vmem>>, vector<1x32x64xf32>
    %1 = vector.shape_cast %0 : vector<1x32x64xf32> to vector<32x64xf32>
    %c0_2 = arith.constant 0 : index
    %c0_3 = arith.constant 0 : index
    %2 = vector.load %arg3[%c0_2, %c0_3] : memref<48x32xf32, #tpu.memory_space<vmem>>, vector<48x32xf32>
    %cst = arith.constant dense<0.000000e+00> : vector<48x64xf32>
    %3 = tpu.matmul %2, %1, %cst {dimension_numbers = #tpu.dot_dimension_numbers<[1], [0], [0], [1], [0, 0, 1, 1], [], []>} : vector<48x32xf32>, vector<32x64xf32>, vector<48x64xf32> -> vector<48x64xf32>
    %c0_4 = arith.constant 0 : index
    %c0_5 = arith.constant 0 : index
    %4 = vector.load %arg4[%c0_4, %c0_5] : memref<48x1xf32, #tpu.memory_space<vmem>>, vector<48x1xf32>
    %5 = vector.broadcast %4 : vector<48x1xf32> to vector<48x64xf32>
    %6 = arith.addf %3, %5 : vector<48x64xf32>
    %cst_6 = arith.constant 3.000000e+00 : f32
    %7 = vector.broadcast %cst_6 : f32 to vector<48x64xf32>
    %8 = arith.addf %6, %7 : vector<48x64xf32>
    %cst_7 = arith.constant 0.000000e+00 : f32
    %cst_8 = arith.constant 6.000000e+00 : f32
    %9 = vector.broadcast %cst_7 : f32 to vector<48x64xf32>
    %10 = arith.maximumf %9, %8 : vector<48x64xf32>
    %11 = vector.broadcast %cst_8 : f32 to vector<48x64xf32>
    %12 = arith.minimumf %11, %10 : vector<48x64xf32>
    %13 = arith.mulf %6, %12 : vector<48x64xf32>
    %cst_9 = arith.constant 0.166666672 : f32
    %14 = vector.broadcast %cst_9 : f32 to vector<48x64xf32>
    %15 = arith.mulf %13, %14 : vector<48x64xf32>
    %c0_10 = arith.constant 0 : index
    %c0_11 = arith.constant 0 : index
    %16 = vector.load %arg5[%c0_10, %c0_11] : memref<64x48xf32, #tpu.memory_space<vmem>>, vector<64x48xf32>
    %cst_12 = arith.constant dense<0.000000e+00> : vector<64x64xf32>
    %17 = tpu.matmul %16, %15, %cst_12 {dimension_numbers = #tpu.dot_dimension_numbers<[1], [0], [0], [1], [0, 0, 1, 1], [], []>} : vector<64x48xf32>, vector<48x64xf32>, vector<64x64xf32> -> vector<64x64xf32>
    %c0_13 = arith.constant 0 : index
    %c0_14 = arith.constant 0 : index
    %18 = vector.load %arg6[%c0_13, %c0_14] : memref<64x1xf32, #tpu.memory_space<vmem>>, vector<64x1xf32>
    %19 = vector.broadcast %18 : vector<64x1xf32> to vector<64x64xf32>
    %20 = arith.addf %17, %19 : vector<64x64xf32>
    %cst_15 = arith.constant 3.000000e+00 : f32
    %21 = vector.broadcast %cst_15 : f32 to vector<64x64xf32>
    %22 = arith.addf %20, %21 : vector<64x64xf32>
    %cst_16 = arith.constant 0.000000e+00 : f32
    %cst_17 = arith.constant 6.000000e+00 : f32
    %23 = vector.broadcast %cst_16 : f32 to vector<64x64xf32>
    %24 = arith.maximumf %23, %22 : vector<64x64xf32>
    %25 = vector.broadcast %cst_17 : f32 to vector<64x64xf32>
    %26 = arith.minimumf %25, %24 : vector<64x64xf32>
    %27 = arith.mulf %20, %26 : vector<64x64xf32>
    %cst_18 = arith.constant 0.166666672 : f32
    %28 = vector.broadcast %cst_18 : f32 to vector<64x64xf32>
    %29 = arith.mulf %27, %28 : vector<64x64xf32>
    %c0_19 = arith.constant 0 : index
    %c0_20 = arith.constant 0 : index
    %c0_21 = arith.constant 0 : index
    %30 = vector.load %arg7[%c0_19, %c0_20, %c0_21] : memref<2x4x16xf32, #tpu.memory_space<vmem>>, vector<1x4x16xf32>
    %31 = vector.shape_cast %30 : vector<1x4x16xf32> to vector<4x16xf32>
    %c0_22 = arith.constant 0 : index
    %c0_23 = arith.constant 0 : index
    %c0_24 = arith.constant 0 : index
    %32 = vector.load %arg8[%c0_22, %c0_23, %c0_24] : memref<2x4x1xf32, #tpu.memory_space<vmem>>, vector<1x4x1xf32>
    %33 = vector.shape_cast %32 : vector<1x4x1xf32> to vector<4x1xf32>
    %c0_25 = arith.constant 0 : index
    %c0_26 = arith.constant 0 : index
    %c0_27 = arith.constant 0 : index
    %34 = vector.load %arg9[%c0_25, %c0_26, %c0_27] : memref<2x8x4xf32, #tpu.memory_space<vmem>>, vector<1x8x4xf32>
    %35 = vector.shape_cast %34 : vector<1x8x4xf32> to vector<8x4xf32>
    %c0_28 = arith.constant 0 : index
    %c0_29 = arith.constant 0 : index
    %c0_30 = arith.constant 0 : index
    %36 = vector.load %arg10[%c0_28, %c0_29, %c0_30] : memref<2x8x1xf32, #tpu.memory_space<vmem>>, vector<1x8x1xf32>
    %37 = vector.shape_cast %36 : vector<1x8x1xf32> to vector<8x1xf32>
    %c0_31 = arith.constant 0 : index
    %c0_32 = arith.constant 0 : index
    %c0_33 = arith.constant 0 : index
    %38 = vector.load %arg11[%c0_31, %c0_32, %c0_33] : memref<2x8x1xf32, #tpu.memory_space<vmem>>, vector<1x8x1xf32>
    %39 = vector.shape_cast %38 : vector<1x8x1xf32> to vector<8x1xf32>
    %c0_34 = arith.constant 0 : index
    %c0_35 = arith.constant 0 : index
    %c0_36 = arith.constant 0 : index
    %40 = vector.load %arg12[%c0_34, %c0_35, %c0_36] : memref<2x1x1xf32, #tpu.memory_space<vmem>>, vector<1x1x1xf32>
    %41 = vector.shape_cast %40 : vector<1x1x1xf32> to vector<1x1xf32>
    %c1 = arith.constant 1 : index
    %c0_37 = arith.constant 0 : index
    %c0_38 = arith.constant 0 : index
    %42 = vector.load %arg7[%c1, %c0_37, %c0_38] : memref<2x4x16xf32, #tpu.memory_space<vmem>>, vector<1x4x16xf32>
    %43 = vector.shape_cast %42 : vector<1x4x16xf32> to vector<4x16xf32>
    %c1_39 = arith.constant 1 : index
    %c0_40 = arith.constant 0 : index
    %c0_41 = arith.constant 0 : index
    %44 = vector.load %arg8[%c1_39, %c0_40, %c0_41] : memref<2x4x1xf32, #tpu.memory_space<vmem>>, vector<1x4x1xf32>
    %45 = vector.shape_cast %44 : vector<1x4x1xf32> to vector<4x1xf32>
    %c1_42 = arith.constant 1 : index
    %c0_43 = arith.constant 0 : index
    %c0_44 = arith.constant 0 : index
    %46 = vector.load %arg9[%c1_42, %c0_43, %c0_44] : memref<2x8x4xf32, #tpu.memory_space<vmem>>, vector<1x8x4xf32>
    %47 = vector.shape_cast %46 : vector<1x8x4xf32> to vector<8x4xf32>
    %c1_45 = arith.constant 1 : index
    %c0_46 = arith.constant 0 : index
    %c0_47 = arith.constant 0 : index
    %48 = vector.load %arg10[%c1_45, %c0_46, %c0_47] : memref<2x8x1xf32, #tpu.memory_space<vmem>>, vector<1x8x1xf32>
    %49 = vector.shape_cast %48 : vector<1x8x1xf32> to vector<8x1xf32>
    %c1_48 = arith.constant 1 : index
    %c0_49 = arith.constant 0 : index
    %c0_50 = arith.constant 0 : index
    %50 = vector.load %arg11[%c1_48, %c0_49, %c0_50] : memref<2x8x1xf32, #tpu.memory_space<vmem>>, vector<1x8x1xf32>
    %51 = vector.shape_cast %50 : vector<1x8x1xf32> to vector<8x1xf32>
    %c1_51 = arith.constant 1 : index
    %c0_52 = arith.constant 0 : index
    %c0_53 = arith.constant 0 : index
    %52 = vector.load %arg12[%c1_51, %c0_52, %c0_53] : memref<2x1x1xf32, #tpu.memory_space<vmem>>, vector<1x1x1xf32>
    %53 = vector.shape_cast %52 : vector<1x1x1xf32> to vector<1x1xf32>
    %54 = tpu.iota {dimensions = array<i32: 1>} : vector<1x64xi32>
    %c64_i32 = arith.constant 64 : i32
    %55 = arith.muli %arg1, %c64_i32 : i32
    %56 = vector.broadcast %55 : i32 to vector<1x64xi32>
    %57 = arith.addi %54, %56 : vector<1x64xi32>
    %c32_i32 = arith.constant 32 : i32
    %58 = vector.broadcast %c32_i32 : i32 to vector<1x64xi32>
    %59 = arith.cmpi slt, %57, %58 : vector<1x64xi32>
    %60 = vector.extract_strided_slice %29 {offsets = [0, 0], sizes = [16, 64], strides = [1, 1]} : vector<64x64xf32> to vector<16x64xf32>
    %cst_54 = arith.constant dense<0.000000e+00> : vector<4x64xf32>
    %61 = tpu.matmul %31, %60, %cst_54 {dimension_numbers = #tpu.dot_dimension_numbers<[1], [0], [0], [1], [0, 0, 1, 1], [], []>} : vector<4x16xf32>, vector<16x64xf32>, vector<4x64xf32> -> vector<4x64xf32>
    %62 = vector.broadcast %33 : vector<4x1xf32> to vector<4x64xf32>
    %63 = arith.addf %61, %62 : vector<4x64xf32>
    %cst_55 = arith.constant dense<0xFF800000> : vector<64xf32>
    %64 = vector.multi_reduction <maximumf>, %63, %cst_55 [0] : vector<4x64xf32> to vector<64xf32>
    %65 = vector.shape_cast %64 : vector<64xf32> to vector<1x64xf32>
    %66 = vector.broadcast %65 : vector<1x64xf32> to vector<4x64xf32>
    %67 = arith.subf %63, %66 : vector<4x64xf32>
    %68 = math.exp %67 : vector<4x64xf32>
    %cst_56 = arith.constant dense<0.000000e+00> : vector<64xf32>
    %69 = vector.multi_reduction <add>, %68, %cst_56 [0] : vector<4x64xf32> to vector<64xf32>
    %70 = vector.shape_cast %69 : vector<64xf32> to vector<1x64xf32>
    %71 = vector.broadcast %70 : vector<1x64xf32> to vector<4x64xf32>
    %72 = arith.divf %68, %71 : vector<4x64xf32>
    %cst_57 = arith.constant dense<0.000000e+00> : vector<8x64xf32>
    %73 = tpu.matmul %35, %72, %cst_57 {dimension_numbers = #tpu.dot_dimension_numbers<[1], [0], [0], [1], [0, 0, 1, 1], [], []>} : vector<8x4xf32>, vector<4x64xf32>, vector<8x64xf32> -> vector<8x64xf32>
    %74 = vector.broadcast %37 : vector<8x1xf32> to vector<8x64xf32>
    %75 = arith.addf %73, %74 : vector<8x64xf32>
    %76 = math.absf %75 : vector<8x64xf32>
    %cst_58 = arith.constant 0.000000e+00 : f32
    %77 = vector.broadcast %cst_58 : f32 to vector<8x64xf32>
    %78 = arith.subf %77, %76 : vector<8x64xf32>
    %79 = math.exp %78 : vector<8x64xf32>
    %80 = math.log1p %79 : vector<8x64xf32>
    %cst_59 = arith.constant 0.000000e+00 : f32
    %81 = vector.broadcast %cst_59 : f32 to vector<8x64xf32>
    %82 = arith.maximumf %75, %81 : vector<8x64xf32>
    %83 = arith.addf %80, %82 : vector<8x64xf32>
    %84 = math.tanh %83 : vector<8x64xf32>
    %85 = arith.mulf %75, %84 : vector<8x64xf32>
    %86 = vector.broadcast %39 : vector<8x1xf32> to vector<8x64xf32>
    %87 = arith.mulf %85, %86 : vector<8x64xf32>
    %cst_60 = arith.constant dense<0.000000e+00> : vector<64xf32>
    %88 = vector.multi_reduction <add>, %87, %cst_60 [0] : vector<8x64xf32> to vector<64xf32>
    %89 = vector.shape_cast %88 : vector<64xf32> to vector<1x64xf32>
    %90 = vector.broadcast %41 : vector<1x1xf32> to vector<1x64xf32>
    %91 = arith.addf %89, %90 : vector<1x64xf32>
    %cst_61 = arith.constant -1.000000e+00 : f32
    %cst_62 = arith.constant 1.000000e+00 : f32
    %92 = vector.broadcast %cst_61 : f32 to vector<1x64xf32>
    %93 = arith.maximumf %92, %91 : vector<1x64xf32>
    %94 = vector.broadcast %cst_62 : f32 to vector<1x64xf32>
    %95 = arith.minimumf %94, %93 : vector<1x64xf32>
    %cst_63 = arith.constant dense<0.000000e+00> : vector<4x64xf32>
    %96 = tpu.matmul %43, %60, %cst_63 {dimension_numbers = #tpu.dot_dimension_numbers<[1], [0], [0], [1], [0, 0, 1, 1], [], []>} : vector<4x16xf32>, vector<16x64xf32>, vector<4x64xf32> -> vector<4x64xf32>
    %97 = vector.broadcast %45 : vector<4x1xf32> to vector<4x64xf32>
    %98 = arith.addf %96, %97 : vector<4x64xf32>
    %cst_64 = arith.constant dense<0xFF800000> : vector<64xf32>
    %99 = vector.multi_reduction <maximumf>, %98, %cst_64 [0] : vector<4x64xf32> to vector<64xf32>
    %100 = vector.shape_cast %99 : vector<64xf32> to vector<1x64xf32>
    %101 = vector.broadcast %100 : vector<1x64xf32> to vector<4x64xf32>
    %102 = arith.subf %98, %101 : vector<4x64xf32>
    %103 = math.exp %102 : vector<4x64xf32>
    %cst_65 = arith.constant dense<0.000000e+00> : vector<64xf32>
    %104 = vector.multi_reduction <add>, %103, %cst_65 [0] : vector<4x64xf32> to vector<64xf32>
    %105 = vector.shape_cast %104 : vector<64xf32> to vector<1x64xf32>
    %106 = vector.broadcast %105 : vector<1x64xf32> to vector<4x64xf32>
    %107 = arith.divf %103, %106 : vector<4x64xf32>
    %cst_66 = arith.constant dense<0.000000e+00> : vector<8x64xf32>
    %108 = tpu.matmul %47, %107, %cst_66 {dimension_numbers = #tpu.dot_dimension_numbers<[1], [0], [0], [1], [0, 0, 1, 1], [], []>} : vector<8x4xf32>, vector<4x64xf32>, vector<8x64xf32> -> vector<8x64xf32>
    %109 = vector.broadcast %49 : vector<8x1xf32> to vector<8x64xf32>
    %110 = arith.addf %108, %109 : vector<8x64xf32>
    %111 = math.absf %110 : vector<8x64xf32>
    %cst_67 = arith.constant 0.000000e+00 : f32
    %112 = vector.broadcast %cst_67 : f32 to vector<8x64xf32>
    %113 = arith.subf %112, %111 : vector<8x64xf32>
    %114 = math.exp %113 : vector<8x64xf32>
    %115 = math.log1p %114 : vector<8x64xf32>
    %cst_68 = arith.constant 0.000000e+00 : f32
    %116 = vector.broadcast %cst_68 : f32 to vector<8x64xf32>
    %117 = arith.maximumf %110, %116 : vector<8x64xf32>
    %118 = arith.addf %115, %117 : vector<8x64xf32>
    %119 = math.tanh %118 : vector<8x64xf32>
    %120 = arith.mulf %110, %119 : vector<8x64xf32>
    %121 = vector.broadcast %51 : vector<8x1xf32> to vector<8x64xf32>
    %122 = arith.mulf %120, %121 : vector<8x64xf32>
    %cst_69 = arith.constant dense<0.000000e+00> : vector<64xf32>
    %123 = vector.multi_reduction <add>, %122, %cst_69 [0] : vector<8x64xf32> to vector<64xf32>
    %124 = vector.shape_cast %123 : vector<64xf32> to vector<1x64xf32>
    %125 = vector.broadcast %53 : vector<1x1xf32> to vector<1x64xf32>
    %126 = arith.addf %124, %125 : vector<1x64xf32>
    %cst_70 = arith.constant -1.000000e+00 : f32
    %cst_71 = arith.constant 1.000000e+00 : f32
    %127 = vector.broadcast %cst_70 : f32 to vector<1x64xf32>
    %128 = arith.maximumf %127, %126 : vector<1x64xf32>
    %129 = vector.broadcast %cst_71 : f32 to vector<1x64xf32>
    %130 = arith.minimumf %129, %128 : vector<1x64xf32>
    %131 = arith.select %59, %95, %130 : vector<1x64xi1>, vector<1x64xf32>
    %132 = vector.extract_strided_slice %29 {offsets = [16, 0], sizes = [16, 64], strides = [1, 1]} : vector<64x64xf32> to vector<16x64xf32>
    %cst_72 = arith.constant dense<0.000000e+00> : vector<4x64xf32>
    %133 = tpu.matmul %31, %132, %cst_72 {dimension_numbers = #tpu.dot_dimension_numbers<[1], [0], [0], [1], [0, 0, 1, 1], [], []>} : vector<4x16xf32>, vector<16x64xf32>, vector<4x64xf32> -> vector<4x64xf32>
    %134 = vector.broadcast %33 : vector<4x1xf32> to vector<4x64xf32>
    %135 = arith.addf %133, %134 : vector<4x64xf32>
    %cst_73 = arith.constant dense<0xFF800000> : vector<64xf32>
    %136 = vector.multi_reduction <maximumf>, %135, %cst_73 [0] : vector<4x64xf32> to vector<64xf32>
    %137 = vector.shape_cast %136 : vector<64xf32> to vector<1x64xf32>
    %138 = vector.broadcast %137 : vector<1x64xf32> to vector<4x64xf32>
    %139 = arith.subf %135, %138 : vector<4x64xf32>
    %140 = math.exp %139 : vector<4x64xf32>
    %cst_74 = arith.constant dense<0.000000e+00> : vector<64xf32>
    %141 = vector.multi_reduction <add>, %140, %cst_74 [0] : vector<4x64xf32> to vector<64xf32>
    %142 = vector.shape_cast %141 : vector<64xf32> to vector<1x64xf32>
    %143 = vector.broadcast %142 : vector<1x64xf32> to vector<4x64xf32>
    %144 = arith.divf %140, %143 : vector<4x64xf32>
    %cst_75 = arith.constant dense<0.000000e+00> : vector<8x64xf32>
    %145 = tpu.matmul %35, %144, %cst_75 {dimension_numbers = #tpu.dot_dimension_numbers<[1], [0], [0], [1], [0, 0, 1, 1], [], []>} : vector<8x4xf32>, vector<4x64xf32>, vector<8x64xf32> -> vector<8x64xf32>
    %146 = vector.broadcast %37 : vector<8x1xf32> to vector<8x64xf32>
    %147 = arith.addf %145, %146 : vector<8x64xf32>
    %148 = math.absf %147 : vector<8x64xf32>
    %cst_76 = arith.constant 0.000000e+00 : f32
    %149 = vector.broadcast %cst_76 : f32 to vector<8x64xf32>
    %150 = arith.subf %149, %148 : vector<8x64xf32>
    %151 = math.exp %150 : vector<8x64xf32>
    %152 = math.log1p %151 : vector<8x64xf32>
    %cst_77 = arith.constant 0.000000e+00 : f32
    %153 = vector.broadcast %cst_77 : f32 to vector<8x64xf32>
    %154 = arith.maximumf %147, %153 : vector<8x64xf32>
    %155 = arith.addf %152, %154 : vector<8x64xf32>
    %156 = math.tanh %155 : vector<8x64xf32>
    %157 = arith.mulf %147, %156 : vector<8x64xf32>
    %158 = vector.broadcast %39 : vector<8x1xf32> to vector<8x64xf32>
    %159 = arith.mulf %157, %158 : vector<8x64xf32>
    %cst_78 = arith.constant dense<0.000000e+00> : vector<64xf32>
    %160 = vector.multi_reduction <add>, %159, %cst_78 [0] : vector<8x64xf32> to vector<64xf32>
    %161 = vector.shape_cast %160 : vector<64xf32> to vector<1x64xf32>
    %162 = vector.broadcast %41 : vector<1x1xf32> to vector<1x64xf32>
    %163 = arith.addf %161, %162 : vector<1x64xf32>
    %cst_79 = arith.constant -1.000000e+00 : f32
    %cst_80 = arith.constant 1.000000e+00 : f32
    %164 = vector.broadcast %cst_79 : f32 to vector<1x64xf32>
    %165 = arith.maximumf %164, %163 : vector<1x64xf32>
    %166 = vector.broadcast %cst_80 : f32 to vector<1x64xf32>
    %167 = arith.minimumf %166, %165 : vector<1x64xf32>
    %cst_81 = arith.constant dense<0.000000e+00> : vector<4x64xf32>
    %168 = tpu.matmul %43, %132, %cst_81 {dimension_numbers = #tpu.dot_dimension_numbers<[1], [0], [0], [1], [0, 0, 1, 1], [], []>} : vector<4x16xf32>, vector<16x64xf32>, vector<4x64xf32> -> vector<4x64xf32>
    %169 = vector.broadcast %45 : vector<4x1xf32> to vector<4x64xf32>
    %170 = arith.addf %168, %169 : vector<4x64xf32>
    %cst_82 = arith.constant dense<0xFF800000> : vector<64xf32>
    %171 = vector.multi_reduction <maximumf>, %170, %cst_82 [0] : vector<4x64xf32> to vector<64xf32>
    %172 = vector.shape_cast %171 : vector<64xf32> to vector<1x64xf32>
    %173 = vector.broadcast %172 : vector<1x64xf32> to vector<4x64xf32>
    %174 = arith.subf %170, %173 : vector<4x64xf32>
    %175 = math.exp %174 : vector<4x64xf32>
    %cst_83 = arith.constant dense<0.000000e+00> : vector<64xf32>
    %176 = vector.multi_reduction <add>, %175, %cst_83 [0] : vector<4x64xf32> to vector<64xf32>
    %177 = vector.shape_cast %176 : vector<64xf32> to vector<1x64xf32>
    %178 = vector.broadcast %177 : vector<1x64xf32> to vector<4x64xf32>
    %179 = arith.divf %175, %178 : vector<4x64xf32>
    %cst_84 = arith.constant dense<0.000000e+00> : vector<8x64xf32>
    %180 = tpu.matmul %47, %179, %cst_84 {dimension_numbers = #tpu.dot_dimension_numbers<[1], [0], [0], [1], [0, 0, 1, 1], [], []>} : vector<8x4xf32>, vector<4x64xf32>, vector<8x64xf32> -> vector<8x64xf32>
    %181 = vector.broadcast %49 : vector<8x1xf32> to vector<8x64xf32>
    %182 = arith.addf %180, %181 : vector<8x64xf32>
    %183 = math.absf %182 : vector<8x64xf32>
    %cst_85 = arith.constant 0.000000e+00 : f32
    %184 = vector.broadcast %cst_85 : f32 to vector<8x64xf32>
    %185 = arith.subf %184, %183 : vector<8x64xf32>
    %186 = math.exp %185 : vector<8x64xf32>
    %187 = math.log1p %186 : vector<8x64xf32>
    %cst_86 = arith.constant 0.000000e+00 : f32
    %188 = vector.broadcast %cst_86 : f32 to vector<8x64xf32>
    %189 = arith.maximumf %182, %188 : vector<8x64xf32>
    %190 = arith.addf %187, %189 : vector<8x64xf32>
    %191 = math.tanh %190 : vector<8x64xf32>
    %192 = arith.mulf %182, %191 : vector<8x64xf32>
    %193 = vector.broadcast %51 : vector<8x1xf32> to vector<8x64xf32>
    %194 = arith.mulf %192, %193 : vector<8x64xf32>
    %cst_87 = arith.constant dense<0.000000e+00> : vector<64xf32>
    %195 = vector.multi_reduction <add>, %194, %cst_87 [0] : vector<8x64xf32> to vector<64xf32>
    %196 = vector.shape_cast %195 : vector<64xf32> to vector<1x64xf32>
    %197 = vector.broadcast %53 : vector<1x1xf32> to vector<1x64xf32>
    %198 = arith.addf %196, %197 : vector<1x64xf32>
    %cst_88 = arith.constant -1.000000e+00 : f32
    %cst_89 = arith.constant 1.000000e+00 : f32
    %199 = vector.broadcast %cst_88 : f32 to vector<1x64xf32>
    %200 = arith.maximumf %199, %198 : vector<1x64xf32>
    %201 = vector.broadcast %cst_89 : f32 to vector<1x64xf32>
    %202 = arith.minimumf %201, %200 : vector<1x64xf32>
    %203 = arith.select %59, %167, %202 : vector<1x64xi1>, vector<1x64xf32>
    %204 = vector.extract_strided_slice %29 {offsets = [32, 0], sizes = [16, 64], strides = [1, 1]} : vector<64x64xf32> to vector<16x64xf32>
    %cst_90 = arith.constant dense<0.000000e+00> : vector<4x64xf32>
    %205 = tpu.matmul %31, %204, %cst_90 {dimension_numbers = #tpu.dot_dimension_numbers<[1], [0], [0], [1], [0, 0, 1, 1], [], []>} : vector<4x16xf32>, vector<16x64xf32>, vector<4x64xf32> -> vector<4x64xf32>
    %206 = vector.broadcast %33 : vector<4x1xf32> to vector<4x64xf32>
    %207 = arith.addf %205, %206 : vector<4x64xf32>
    %cst_91 = arith.constant dense<0xFF800000> : vector<64xf32>
    %208 = vector.multi_reduction <maximumf>, %207, %cst_91 [0] : vector<4x64xf32> to vector<64xf32>
    %209 = vector.shape_cast %208 : vector<64xf32> to vector<1x64xf32>
    %210 = vector.broadcast %209 : vector<1x64xf32> to vector<4x64xf32>
    %211 = arith.subf %207, %210 : vector<4x64xf32>
    %212 = math.exp %211 : vector<4x64xf32>
    %cst_92 = arith.constant dense<0.000000e+00> : vector<64xf32>
    %213 = vector.multi_reduction <add>, %212, %cst_92 [0] : vector<4x64xf32> to vector<64xf32>
    %214 = vector.shape_cast %213 : vector<64xf32> to vector<1x64xf32>
    %215 = vector.broadcast %214 : vector<1x64xf32> to vector<4x64xf32>
    %216 = arith.divf %212, %215 : vector<4x64xf32>
    %cst_93 = arith.constant dense<0.000000e+00> : vector<8x64xf32>
    %217 = tpu.matmul %35, %216, %cst_93 {dimension_numbers = #tpu.dot_dimension_numbers<[1], [0], [0], [1], [0, 0, 1, 1], [], []>} : vector<8x4xf32>, vector<4x64xf32>, vector<8x64xf32> -> vector<8x64xf32>
    %218 = vector.broadcast %37 : vector<8x1xf32> to vector<8x64xf32>
    %219 = arith.addf %217, %218 : vector<8x64xf32>
    %220 = math.absf %219 : vector<8x64xf32>
    %cst_94 = arith.constant 0.000000e+00 : f32
    %221 = vector.broadcast %cst_94 : f32 to vector<8x64xf32>
    %222 = arith.subf %221, %220 : vector<8x64xf32>
    %223 = math.exp %222 : vector<8x64xf32>
    %224 = math.log1p %223 : vector<8x64xf32>
    %cst_95 = arith.constant 0.000000e+00 : f32
    %225 = vector.broadcast %cst_95 : f32 to vector<8x64xf32>
    %226 = arith.maximumf %219, %225 : vector<8x64xf32>
    %227 = arith.addf %224, %226 : vector<8x64xf32>
    %228 = math.tanh %227 : vector<8x64xf32>
    %229 = arith.mulf %219, %228 : vector<8x64xf32>
    %230 = vector.broadcast %39 : vector<8x1xf32> to vector<8x64xf32>
    %231 = arith.mulf %229, %230 : vector<8x64xf32>
    %cst_96 = arith.constant dense<0.000000e+00> : vector<64xf32>
    %232 = vector.multi_reduction <add>, %231, %cst_96 [0] : vector<8x64xf32> to vector<64xf32>
    %233 = vector.shape_cast %232 : vector<64xf32> to vector<1x64xf32>
    %234 = vector.broadcast %41 : vector<1x1xf32> to vector<1x64xf32>
    %235 = arith.addf %233, %234 : vector<1x64xf32>
    %cst_97 = arith.constant -1.000000e+00 : f32
    %cst_98 = arith.constant 1.000000e+00 : f32
    %236 = vector.broadcast %cst_97 : f32 to vector<1x64xf32>
    %237 = arith.maximumf %236, %235 : vector<1x64xf32>
    %238 = vector.broadcast %cst_98 : f32 to vector<1x64xf32>
    %239 = arith.minimumf %238, %237 : vector<1x64xf32>
    %cst_99 = arith.constant dense<0.000000e+00> : vector<4x64xf32>
    %240 = tpu.matmul %43, %204, %cst_99 {dimension_numbers = #tpu.dot_dimension_numbers<[1], [0], [0], [1], [0, 0, 1, 1], [], []>} : vector<4x16xf32>, vector<16x64xf32>, vector<4x64xf32> -> vector<4x64xf32>
    %241 = vector.broadcast %45 : vector<4x1xf32> to vector<4x64xf32>
    %242 = arith.addf %240, %241 : vector<4x64xf32>
    %cst_100 = arith.constant dense<0xFF800000> : vector<64xf32>
    %243 = vector.multi_reduction <maximumf>, %242, %cst_100 [0] : vector<4x64xf32> to vector<64xf32>
    %244 = vector.shape_cast %243 : vector<64xf32> to vector<1x64xf32>
    %245 = vector.broadcast %244 : vector<1x64xf32> to vector<4x64xf32>
    %246 = arith.subf %242, %245 : vector<4x64xf32>
    %247 = math.exp %246 : vector<4x64xf32>
    %cst_101 = arith.constant dense<0.000000e+00> : vector<64xf32>
    %248 = vector.multi_reduction <add>, %247, %cst_101 [0] : vector<4x64xf32> to vector<64xf32>
    %249 = vector.shape_cast %248 : vector<64xf32> to vector<1x64xf32>
    %250 = vector.broadcast %249 : vector<1x64xf32> to vector<4x64xf32>
    %251 = arith.divf %247, %250 : vector<4x64xf32>
    %cst_102 = arith.constant dense<0.000000e+00> : vector<8x64xf32>
    %252 = tpu.matmul %47, %251, %cst_102 {dimension_numbers = #tpu.dot_dimension_numbers<[1], [0], [0], [1], [0, 0, 1, 1], [], []>} : vector<8x4xf32>, vector<4x64xf32>, vector<8x64xf32> -> vector<8x64xf32>
    %253 = vector.broadcast %49 : vector<8x1xf32> to vector<8x64xf32>
    %254 = arith.addf %252, %253 : vector<8x64xf32>
    %255 = math.absf %254 : vector<8x64xf32>
    %cst_103 = arith.constant 0.000000e+00 : f32
    %256 = vector.broadcast %cst_103 : f32 to vector<8x64xf32>
    %257 = arith.subf %256, %255 : vector<8x64xf32>
    %258 = math.exp %257 : vector<8x64xf32>
    %259 = math.log1p %258 : vector<8x64xf32>
    %cst_104 = arith.constant 0.000000e+00 : f32
    %260 = vector.broadcast %cst_104 : f32 to vector<8x64xf32>
    %261 = arith.maximumf %254, %260 : vector<8x64xf32>
    %262 = arith.addf %259, %261 : vector<8x64xf32>
    %263 = math.tanh %262 : vector<8x64xf32>
    %264 = arith.mulf %254, %263 : vector<8x64xf32>
    %265 = vector.broadcast %51 : vector<8x1xf32> to vector<8x64xf32>
    %266 = arith.mulf %264, %265 : vector<8x64xf32>
    %cst_105 = arith.constant dense<0.000000e+00> : vector<64xf32>
    %267 = vector.multi_reduction <add>, %266, %cst_105 [0] : vector<8x64xf32> to vector<64xf32>
    %268 = vector.shape_cast %267 : vector<64xf32> to vector<1x64xf32>
    %269 = vector.broadcast %53 : vector<1x1xf32> to vector<1x64xf32>
    %270 = arith.addf %268, %269 : vector<1x64xf32>
    %cst_106 = arith.constant -1.000000e+00 : f32
    %cst_107 = arith.constant 1.000000e+00 : f32
    %271 = vector.broadcast %cst_106 : f32 to vector<1x64xf32>
    %272 = arith.maximumf %271, %270 : vector<1x64xf32>
    %273 = vector.broadcast %cst_107 : f32 to vector<1x64xf32>
    %274 = arith.minimumf %273, %272 : vector<1x64xf32>
    %275 = arith.select %59, %239, %274 : vector<1x64xi1>, vector<1x64xf32>
    %276 = vector.extract_strided_slice %29 {offsets = [48, 0], sizes = [16, 64], strides = [1, 1]} : vector<64x64xf32> to vector<16x64xf32>
    %cst_108 = arith.constant dense<0.000000e+00> : vector<4x64xf32>
    %277 = tpu.matmul %31, %276, %cst_108 {dimension_numbers = #tpu.dot_dimension_numbers<[1], [0], [0], [1], [0, 0, 1, 1], [], []>} : vector<4x16xf32>, vector<16x64xf32>, vector<4x64xf32> -> vector<4x64xf32>
    %278 = vector.broadcast %33 : vector<4x1xf32> to vector<4x64xf32>
    %279 = arith.addf %277, %278 : vector<4x64xf32>
    %cst_109 = arith.constant dense<0xFF800000> : vector<64xf32>
    %280 = vector.multi_reduction <maximumf>, %279, %cst_109 [0] : vector<4x64xf32> to vector<64xf32>
    %281 = vector.shape_cast %280 : vector<64xf32> to vector<1x64xf32>
    %282 = vector.broadcast %281 : vector<1x64xf32> to vector<4x64xf32>
    %283 = arith.subf %279, %282 : vector<4x64xf32>
    %284 = math.exp %283 : vector<4x64xf32>
    %cst_110 = arith.constant dense<0.000000e+00> : vector<64xf32>
    %285 = vector.multi_reduction <add>, %284, %cst_110 [0] : vector<4x64xf32> to vector<64xf32>
    %286 = vector.shape_cast %285 : vector<64xf32> to vector<1x64xf32>
    %287 = vector.broadcast %286 : vector<1x64xf32> to vector<4x64xf32>
    %288 = arith.divf %284, %287 : vector<4x64xf32>
    %cst_111 = arith.constant dense<0.000000e+00> : vector<8x64xf32>
    %289 = tpu.matmul %35, %288, %cst_111 {dimension_numbers = #tpu.dot_dimension_numbers<[1], [0], [0], [1], [0, 0, 1, 1], [], []>} : vector<8x4xf32>, vector<4x64xf32>, vector<8x64xf32> -> vector<8x64xf32>
    %290 = vector.broadcast %37 : vector<8x1xf32> to vector<8x64xf32>
    %291 = arith.addf %289, %290 : vector<8x64xf32>
    %292 = math.absf %291 : vector<8x64xf32>
    %cst_112 = arith.constant 0.000000e+00 : f32
    %293 = vector.broadcast %cst_112 : f32 to vector<8x64xf32>
    %294 = arith.subf %293, %292 : vector<8x64xf32>
    %295 = math.exp %294 : vector<8x64xf32>
    %296 = math.log1p %295 : vector<8x64xf32>
    %cst_113 = arith.constant 0.000000e+00 : f32
    %297 = vector.broadcast %cst_113 : f32 to vector<8x64xf32>
    %298 = arith.maximumf %291, %297 : vector<8x64xf32>
    %299 = arith.addf %296, %298 : vector<8x64xf32>
    %300 = math.tanh %299 : vector<8x64xf32>
    %301 = arith.mulf %291, %300 : vector<8x64xf32>
    %302 = vector.broadcast %39 : vector<8x1xf32> to vector<8x64xf32>
    %303 = arith.mulf %301, %302 : vector<8x64xf32>
    %cst_114 = arith.constant dense<0.000000e+00> : vector<64xf32>
    %304 = vector.multi_reduction <add>, %303, %cst_114 [0] : vector<8x64xf32> to vector<64xf32>
    %305 = vector.shape_cast %304 : vector<64xf32> to vector<1x64xf32>
    %306 = vector.broadcast %41 : vector<1x1xf32> to vector<1x64xf32>
    %307 = arith.addf %305, %306 : vector<1x64xf32>
    %cst_115 = arith.constant -1.000000e+00 : f32
    %cst_116 = arith.constant 1.000000e+00 : f32
    %308 = vector.broadcast %cst_115 : f32 to vector<1x64xf32>
    %309 = arith.maximumf %308, %307 : vector<1x64xf32>
    %310 = vector.broadcast %cst_116 : f32 to vector<1x64xf32>
    %311 = arith.minimumf %310, %309 : vector<1x64xf32>
    %cst_117 = arith.constant dense<0.000000e+00> : vector<4x64xf32>
    %312 = tpu.matmul %43, %276, %cst_117 {dimension_numbers = #tpu.dot_dimension_numbers<[1], [0], [0], [1], [0, 0, 1, 1], [], []>} : vector<4x16xf32>, vector<16x64xf32>, vector<4x64xf32> -> vector<4x64xf32>
    %313 = vector.broadcast %45 : vector<4x1xf32> to vector<4x64xf32>
    %314 = arith.addf %312, %313 : vector<4x64xf32>
    %cst_118 = arith.constant dense<0xFF800000> : vector<64xf32>
    %315 = vector.multi_reduction <maximumf>, %314, %cst_118 [0] : vector<4x64xf32> to vector<64xf32>
    %316 = vector.shape_cast %315 : vector<64xf32> to vector<1x64xf32>
    %317 = vector.broadcast %316 : vector<1x64xf32> to vector<4x64xf32>
    %318 = arith.subf %314, %317 : vector<4x64xf32>
    %319 = math.exp %318 : vector<4x64xf32>
    %cst_119 = arith.constant dense<0.000000e+00> : vector<64xf32>
    %320 = vector.multi_reduction <add>, %319, %cst_119 [0] : vector<4x64xf32> to vector<64xf32>
    %321 = vector.shape_cast %320 : vector<64xf32> to vector<1x64xf32>
    %322 = vector.broadcast %321 : vector<1x64xf32> to vector<4x64xf32>
    %323 = arith.divf %319, %322 : vector<4x64xf32>
    %cst_120 = arith.constant dense<0.000000e+00> : vector<8x64xf32>
    %324 = tpu.matmul %47, %323, %cst_120 {dimension_numbers = #tpu.dot_dimension_numbers<[1], [0], [0], [1], [0, 0, 1, 1], [], []>} : vector<8x4xf32>, vector<4x64xf32>, vector<8x64xf32> -> vector<8x64xf32>
    %325 = vector.broadcast %49 : vector<8x1xf32> to vector<8x64xf32>
    %326 = arith.addf %324, %325 : vector<8x64xf32>
    %327 = math.absf %326 : vector<8x64xf32>
    %cst_121 = arith.constant 0.000000e+00 : f32
    %328 = vector.broadcast %cst_121 : f32 to vector<8x64xf32>
    %329 = arith.subf %328, %327 : vector<8x64xf32>
    %330 = math.exp %329 : vector<8x64xf32>
    %331 = math.log1p %330 : vector<8x64xf32>
    %cst_122 = arith.constant 0.000000e+00 : f32
    %332 = vector.broadcast %cst_122 : f32 to vector<8x64xf32>
    %333 = arith.maximumf %326, %332 : vector<8x64xf32>
    %334 = arith.addf %331, %333 : vector<8x64xf32>
    %335 = math.tanh %334 : vector<8x64xf32>
    %336 = arith.mulf %326, %335 : vector<8x64xf32>
    %337 = vector.broadcast %51 : vector<8x1xf32> to vector<8x64xf32>
    %338 = arith.mulf %336, %337 : vector<8x64xf32>
    %cst_123 = arith.constant dense<0.000000e+00> : vector<64xf32>
    %339 = vector.multi_reduction <add>, %338, %cst_123 [0] : vector<8x64xf32> to vector<64xf32>
    %340 = vector.shape_cast %339 : vector<64xf32> to vector<1x64xf32>
    %341 = vector.broadcast %53 : vector<1x1xf32> to vector<1x64xf32>
    %342 = arith.addf %340, %341 : vector<1x64xf32>
    %cst_124 = arith.constant -1.000000e+00 : f32
    %cst_125 = arith.constant 1.000000e+00 : f32
    %343 = vector.broadcast %cst_124 : f32 to vector<1x64xf32>
    %344 = arith.maximumf %343, %342 : vector<1x64xf32>
    %345 = vector.broadcast %cst_125 : f32 to vector<1x64xf32>
    %346 = arith.minimumf %345, %344 : vector<1x64xf32>
    %347 = arith.select %59, %311, %346 : vector<1x64xi1>, vector<1x64xf32>
    %348 = tpu.concatenate %131, %203, %275, %347 in 0 : vector<1x64xf32>, vector<1x64xf32>, vector<1x64xf32>, vector<1x64xf32> -> vector<4x64xf32>
    %c0_126 = arith.constant 0 : index
    %c0_127 = arith.constant 0 : index
    %c0_128 = arith.constant 0 : index
    %349 = vector.load %arg13[%c0_126, %c0_127, %c0_128] : memref<1x4x64xf32, #tpu.memory_space<vmem>>, vector<1x4x64xf32>
    %350 = vector.shape_cast %349 : vector<1x4x64xf32> to vector<4x64xf32>
    %351 = vector.shape_cast %348 : vector<4x64xf32> to vector<1x4x64xf32>
    tpu.vector_store %arg13[%c0_126, %c0_127, %c0_128], %351 {strides = array<i32>} : memref<1x4x64xf32, #tpu.memory_space<vmem>>, vector<1x4x64xf32>,
    return
  }
  func.func @transform_0(%arg0: i32, %arg1: i32) -> (i32, i32, i32) {
    %c0_i32 = arith.constant 0 : i32
    %c0_i32_0 = arith.constant 0 : i32
    return %arg0, %c0_i32, %arg1 : i32, i32, i32
  }
  func.func @transform_1(%arg0: i32, %arg1: i32) -> (i32, i32) {
    %c0_i32 = arith.constant 0 : i32
    %c0_i32_0 = arith.constant 0 : i32
    %c0_i32_1 = arith.constant 0 : i32
    return %c0_i32, %c0_i32_0 : i32, i32
  }
  func.func @transform_2(%arg0: i32, %arg1: i32) -> (i32, i32) {
    %c0_i32 = arith.constant 0 : i32
    %c0_i32_0 = arith.constant 0 : i32
    %c0_i32_1 = arith.constant 0 : i32
    return %c0_i32, %c0_i32_0 : i32, i32
  }
  func.func @transform_3(%arg0: i32, %arg1: i32) -> (i32, i32) {
    %c0_i32 = arith.constant 0 : i32
    %c0_i32_0 = arith.constant 0 : i32
    %c0_i32_1 = arith.constant 0 : i32
    return %c0_i32, %c0_i32_0 : i32, i32
  }
  func.func @transform_4(%arg0: i32, %arg1: i32) -> (i32, i32) {
    %c0_i32 = arith.constant 0 : i32
    %c0_i32_0 = arith.constant 0 : i32
    %c0_i32_1 = arith.constant 0 : i32
    return %c0_i32, %c0_i32_0 : i32, i32
  }
  func.func @transform_5(%arg0: i32, %arg1: i32) -> (i32, i32, i32) {
    %c0_i32 = arith.constant 0 : i32
    %c0_i32_0 = arith.constant 0 : i32
    %c0_i32_1 = arith.constant 0 : i32
    %c0_i32_2 = arith.constant 0 : i32
    return %c0_i32, %c0_i32_0, %c0_i32_1 : i32, i32, i32
  }
  func.func @transform_6(%arg0: i32, %arg1: i32) -> (i32, i32, i32) {
    %c0_i32 = arith.constant 0 : i32
    %c0_i32_0 = arith.constant 0 : i32
    %c0_i32_1 = arith.constant 0 : i32
    %c0_i32_2 = arith.constant 0 : i32
    return %c0_i32, %c0_i32_0, %c0_i32_1 : i32, i32, i32
  }
  func.func @transform_7(%arg0: i32, %arg1: i32) -> (i32, i32, i32) {
    %c0_i32 = arith.constant 0 : i32
    %c0_i32_0 = arith.constant 0 : i32
    %c0_i32_1 = arith.constant 0 : i32
    %c0_i32_2 = arith.constant 0 : i32
    return %c0_i32, %c0_i32_0, %c0_i32_1 : i32, i32, i32
  }
  func.func @transform_8(%arg0: i32, %arg1: i32) -> (i32, i32, i32) {
    %c0_i32 = arith.constant 0 : i32
    %c0_i32_0 = arith.constant 0 : i32
    %c0_i32_1 = arith.constant 0 : i32
    %c0_i32_2 = arith.constant 0 : i32
    return %c0_i32, %c0_i32_0, %c0_i32_1 : i32, i32, i32
  }
  func.func @transform_9(%arg0: i32, %arg1: i32) -> (i32, i32, i32) {
    %c0_i32 = arith.constant 0 : i32
    %c0_i32_0 = arith.constant 0 : i32
    %c0_i32_1 = arith.constant 0 : i32
    %c0_i32_2 = arith.constant 0 : i32
    return %c0_i32, %c0_i32_0, %c0_i32_1 : i32, i32, i32
  }
  func.func @transform_10(%arg0: i32, %arg1: i32) -> (i32, i32, i32) {
    %c0_i32 = arith.constant 0 : i32
    %c0_i32_0 = arith.constant 0 : i32
    %c0_i32_1 = arith.constant 0 : i32
    %c0_i32_2 = arith.constant 0 : i32
    return %c0_i32, %c0_i32_0, %c0_i32_1 : i32, i32, i32
  }
  func.func @transform_11(%arg0: i32, %arg1: i32) -> (i32, i32, i32) {
    %c0_i32 = arith.constant 0 : i32
    %c0_i32_0 = arith.constant 0 : i32
    return %arg0, %c0_i32, %arg1 : i32, i32, i32
  }
}

</mosaic_0001>

<bundles_post_ra>
// kernel: tile.18
= control target key start
LH: loop header
LB: loop body
LE: loop exit
PB: predicated region body
PF: predicated region fallthrough
CT: control target
= control target key end

     0   :  { %s22_s0 = inlined_call_operand.vmem [shape: f32[16], index: 0, kind: input, shape index: {}]   ;;  %s23_s1 = inlined_call_operand.vmem [shape: f32[4,16], index: 1, kind: output, shape index: {}]  }
   0x1   :  { %v4_v0 = vld [vmem:[%s22_s0] ss:$0 sm:$0xff] }
   0x2   :  { %5 = vst [vmem:[%s23_s1] sm:$0xf] %v4_v0 }

// kernel: tile.1
= control target key start
LH: loop header
LB: loop body
LE: loop exit
PB: predicated region body
PF: predicated region fallthrough
CT: control target
= control target key end

     0   :  { %s176_s8 = smov 125   ;;  %s177_s9 = smov 126   ;;  %vm7_vm0 = vcmask 7168   ;;  %s331_s0 = inlined_call_operand.vmem [shape: f32[4,16], index: 0, kind: input, shape index: {}]   ;;  %s332_s1 = inlined_call_operand.vmem [shape: f32[64,1], index: 1, kind: output, shape index: {}]  }
   0x1   :  { %v4_v0 = vld [vmem:[%s331_s0] sm:$0xf]  ;;  %s175_s0 = smov 127   ;;  %s178_s10 = smov 124  }
   0x2   :  { %5 = vst [vmem:[#allocation0] sm:$0xf] %v4_v0  ;;  %s179_s11 = smov 123   ;;  %s180_s12 = smov 122  }
   0x3   :  { %s181_s13 = smov 121   ;;  %s182_s14 = smov 120  }
   0x4   :  { %s183_s19 = smov 119   ;;  %s184_s20 = smov 118  }
   0x5   :  { %s185_s21 = smov 117   ;;  %s186_s22 = smov 116  }
   0x6   :  { %s187_s23 = smov 115   ;;  %s188_s24 = smov 114  }
   0x7   :  { %s189_s25 = smov 113  }
   0x9   :  { %v10_v1 = vld [vmem:[#allocation0] sm:$0xf]  }
   0xa   :  { %v26_v2 = vld [vmem:[#allocation0] sm:$0xf]   ;;  %11 = vrot.lane.b32.xlu0 %v10_v1, %s175_s0 }
   0xb   :  { %27 = vrot.lane.b32.xlu1 %v26_v2, %s176_s8  ;;  %v18_v3 = vld [vmem:[#allocation0] sm:$0xf]  }
   0xc   :  { %v34_v4 = vld [vmem:[#allocation0] sm:$0xf]  }
   0xd   :  { %v42_v5 = vld [vmem:[#allocation0] sm:$0xf]  }
   0xe   :  { %19 = vrot.lane.b32.xlu0 %v18_v3, %s177_s9  ;;  %v50_v6 = vld [vmem:[#allocation0] sm:$0xf]  }
   0xf   :  { %35 = vrot.lane.b32.xlu1 %v34_v4, %s178_s10  ;;  %v58_v7 = vld [vmem:[#allocation0] sm:$0xf]  }
  0x10   :  { %v66_v8 = vld [vmem:[#allocation0] sm:$0xf]  }
  0x11   :  { %v74_v9 = vld [vmem:[#allocation0] sm:$0xf]  }
  0x12   :  { %43 = vrot.lane.b32.xlu0 %v42_v5, %s179_s11  ;;  %v82_v10 = vld [vmem:[#allocation0] sm:$0xf]  }
  0x13   :  { %51 = vrot.lane.b32.xlu1 %v50_v6, %s180_s12  ;;  %v6_v11 = vld [vmem:[#allocation0] sm:$0xf]  }
  0x14   :  { %8 = vst.msk [vmem:[%s332_s1] ss:$16 sm:$0x3] %vm7_vm0, %v6_v11   ;;  %9 = vst.msk [vmem:[%s332_s1] ss:$16 sm:$0xc] %vm7_vm0, %v6_v11  }
  0x15   :  { %v90_v12 = vld [vmem:[#allocation0] sm:$0xf]  }
  0x16   :  { %59 = vrot.lane.b32.xlu0 %v58_v7, %s181_s13  ;;  %v98_v13 = vld [vmem:[#allocation0] sm:$0xf]  }
  0x17   :  { %67 = vrot.lane.b32.xlu1 %v66_v8, %s182_s14  ;;  %v106_v14 = vld [vmem:[#allocation0] sm:$0xf]  }
  0x18   :  { %v114_v15 = vld [vmem:[#allocation0] sm:$0xf]  }
  0x19   :  { %v122_v16 = vld [vmem:[#allocation0] sm:$0xf]  }
  0x1a   :  { %75 = vrot.lane.b32.xlu0 %v74_v9, %s183_s19 }
  0x1b   :  { %83 = vrot.lane.b32.xlu1 %v82_v10, %s184_s20 }
  0x1e   :  { %91 = vrot.lane.b32.xlu0 %v90_v12, %s185_s21 }
  0x1f   :  { %99 = vrot.lane.b32.xlu1 %v98_v13, %s186_s22 }
  0x22   :  { %107 = vrot.lane.b32.xlu0 %v106_v14, %s187_s23 }
  0x23   :  { %115 = vrot.lane.b32.xlu1 %v114_v15, %s188_s24 }
  0x26   :  { %123 = vrot.lane.b32.xlu0 %v122_v16, %s189_s25 }
  0x7c   :  { %v12_v17 = vpop.permute.xlu0 %11  }
  0x7d   :  { %v28_v18 = vpop.permute.xlu1 %27   ;;  %130 = vst.msk [vmem:[%s332_s1 + $0x1] ss:$16 sm:$0x3] %vm7_vm0, %v12_v17   ;;  %131 = vst.msk [vmem:[%s332_s1 + $0x1] ss:$16 sm:$0xc] %vm7_vm0, %v12_v17  }
  0x7e   :  { %134 = vst.msk [vmem:[%s332_s1 + $0x3] ss:$16 sm:$0x3] %vm7_vm0, %v28_v18   ;;  %135 = vst.msk [vmem:[%s332_s1 + $0x3] ss:$16 sm:$0xc] %vm7_vm0, %v28_v18  }
  0x80   :  { %v20_v19 = vpop.permute.xlu0 %19  }
  0x81   :  { %v36_v20 = vpop.permute.xlu1 %35   ;;  %132 = vst.msk [vmem:[%s332_s1 + $0x2] ss:$16 sm:$0x3] %vm7_vm0, %v20_v19   ;;  %133 = vst.msk [vmem:[%s332_s1 + $0x2] ss:$16 sm:$0xc] %vm7_vm0, %v20_v19  }
  0x82   :  { %136 = vst.msk [vmem:[%s332_s1 + $0x4] ss:$16 sm:$0x3] %vm7_vm0, %v36_v20   ;;  %137 = vst.msk [vmem:[%s332_s1 + $0x4] ss:$16 sm:$0xc] %vm7_vm0, %v36_v20  }
  0x84   :  { %v44_v21 = vpop.permute.xlu0 %43  }
  0x85   :  { %v52_v22 = vpop.permute.xlu1 %51   ;;  %138 = vst.msk [vmem:[%s332_s1 + $0x5] ss:$16 sm:$0x3] %vm7_vm0, %v44_v21   ;;  %139 = vst.msk [vmem:[%s332_s1 + $0x5] ss:$16 sm:$0xc] %vm7_vm0, %v44_v21  }
  0x86   :  { %140 = vst.msk [vmem:[%s332_s1 + $0x6] ss:$16 sm:$0x3] %vm7_vm0, %v52_v22   ;;  %141 = vst.msk [vmem:[%s332_s1 + $0x6] ss:$16 sm:$0xc] %vm7_vm0, %v52_v22  }
  0x88   :  { %v60_v23 = vpop.permute.xlu0 %59  }
  0x89   :  { %v68_v24 = vpop.permute.xlu1 %67   ;;  %142 = vst.msk [vmem:[%s332_s1 + $0x7] ss:$16 sm:$0x3] %vm7_vm0, %v60_v23   ;;  %143 = vst.msk [vmem:[%s332_s1 + $0x7] ss:$16 sm:$0xc] %vm7_vm0, %v60_v23  }
  0x8a   :  { %144 = vst.msk [vmem:[%s332_s1 + $0x8] ss:$16 sm:$0x3] %vm7_vm0, %v68_v24   ;;  %145 = vst.msk [vmem:[%s332_s1 + $0x8] ss:$16 sm:$0xc] %vm7_vm0, %v68_v24  }
  0x8c   :  { %v76_v25 = vpop.permute.xlu0 %75  }
  0x8d   :  { %v84_v26 = vpop.permute.xlu1 %83   ;;  %146 = vst.msk [vmem:[%s332_s1 + $0x9] ss:$16 sm:$0x3] %vm7_vm0, %v76_v25   ;;  %147 = vst.msk [vmem:[%s332_s1 + $0x9] ss:$16 sm:$0xc] %vm7_vm0, %v76_v25  }
  0x8e   :  { %148 = vst.msk [vmem:[%s332_s1 + $0xa] ss:$16 sm:$0x3] %vm7_vm0, %v84_v26   ;;  %149 = vst.msk [vmem:[%s332_s1 + $0xa] ss:$16 sm:$0xc] %vm7_vm0, %v84_v26  }
  0x90   :  { %v92_v27 = vpop.permute.xlu0 %91  }
  0x91   :  { %v100_v28 = vpop.permute.xlu1 %99   ;;  %150 = vst.msk [vmem:[%s332_s1 + $0xb] ss:$16 sm:$0x3] %vm7_vm0, %v92_v27   ;;  %151 = vst.msk [vmem:[%s332_s1 + $0xb] ss:$16 sm:$0xc] %vm7_vm0, %v92_v27  }
  0x92   :  { %152 = vst.msk [vmem:[%s332_s1 + $0xc] ss:$16 sm:$0x3] %vm7_vm0, %v100_v28   ;;  %153 = vst.msk [vmem:[%s332_s1 + $0xc] ss:$16 sm:$0xc] %vm7_vm0, %v100_v28  }
  0x94   :  { %v108_v29 = vpop.permute.xlu0 %107  }
  0x95   :  { %v116_v30 = vpop.permute.xlu1 %115   ;;  %154 = vst.msk [vmem:[%s332_s1 + $0xd] ss:$16 sm:$0x3] %vm7_vm0, %v108_v29   ;;  %155 = vst.msk [vmem:[%s332_s1 + $0xd] ss:$16 sm:$0xc] %vm7_vm0, %v108_v29  }
  0x96   :  { %156 = vst.msk [vmem:[%s332_s1 + $0xe] ss:$16 sm:$0x3] %vm7_vm0, %v116_v30   ;;  %157 = vst.msk [vmem:[%s332_s1 + $0xe] ss:$16 sm:$0xc] %vm7_vm0, %v116_v30  }
  0x98   :  { %v124_v31 = vpop.permute.xlu0 %123  }
  0x99   :  { %158 = vst.msk [vmem:[%s332_s1 + $0xf] ss:$16 sm:$0x3] %vm7_vm0, %v124_v31   ;;  %159 = vst.msk [vmem:[%s332_s1 + $0xf] ss:$16 sm:$0xc] %vm7_vm0, %v124_v31  }

// kernel: tile.13
= control target key start
LH: loop header
LB: loop body
LE: loop exit
PB: predicated region body
PF: predicated region fallthrough
CT: control target
= control target key end

     0   :  { %s22_s0 = inlined_call_operand.vmem [shape: f32[24], index: 0, kind: input, shape index: {}]   ;;  %s23_s1 = inlined_call_operand.vmem [shape: f32[2,24], index: 1, kind: output, shape index: {}]  }
   0x1   :  { %v4_v0 = vld [vmem:[%s22_s0] ss:$0 sm:$0xff] }
   0x2   :  { %5 = vst [vmem:[%s23_s1] sm:$0x3] %v4_v0 }

// kernel: tile.0
= control target key start
LH: loop header
LB: loop body
LE: loop exit
PB: predicated region body
PF: predicated region fallthrough
CT: control target
= control target key end

     0   :  { %s226_s8 = smov 125   ;;  %s227_s9 = smov 126   ;;  %vm7_vm0 = vcmask 7168   ;;  %s357_s0 = inlined_call_operand.vmem [shape: f32[2,24], index: 0, kind: input, shape index: {}]   ;;  %s358_s1 = inlined_call_operand.vmem [shape: f32[48,1], index: 1, kind: output, shape index: {}]  }
   0x1   :  { %v4_v0 = vld [vmem:[%s357_s0] sm:$0x3]  ;;  %s225_s0 = smov 127   ;;  %s228_s10 = smov 124  }
   0x2   :  { %5 = vst [vmem:[#allocation0] sm:$0x3] %v4_v0  ;;  %s52_s11 = smov 3  ;;  %s229_s12 = smov 123  }
   0x3   :  { %s230_s13 = smov 122   ;;  %s60_s14 = smov 3 }
   0x4   :  { %s68_s15 = smov 3  ;;  %s231_s16 = smov 121  }
   0x5   :  { %s232_s17 = smov 120   ;;  %s76_s18 = smov 3 }
   0x6   :  { %s84_s19 = smov 3  ;;  %s233_s20 = smov 119  }
   0x7   :  { %s234_s21 = smov 118   ;;  %s92_s22 = smov 3 }
   0x8   :  { %s100_s23 = smov 3  ;;  %s235_s24 = smov 117  }
   0x9   :  { %v9_v1 = vld [vmem:[#allocation0] sm:$0x3]   ;;  %s236_s25 = smov 116   ;;  %s108_s26 = smov 3 }
   0xa   :  { %v21_v2 = vld [vmem:[#allocation0] sm:$0x3]   ;;  %10 = vrot.lane.b32.xlu0 %v9_v1, %s225_s0  ;;  %s116_s27 = smov 3  ;;  %s237_s28 = smov 115  }
   0xb   :  { %22 = vrot.lane.b32.xlu1 %v21_v2, %s226_s8  ;;  %v15_v3 = vld [vmem:[#allocation0] sm:$0x3]   ;;  %s238_s29 = smov 114   ;;  %s124_s30 = smov 3 }
   0xc   :  { %v27_v4 = vld [vmem:[#allocation0] sm:$0x3]   ;;  %s132_s2 = smov 3  ;;  %s239_s3 = smov 113  }
   0xd   :  { %v33_v5 = vld [vmem:[#allocation0] sm:$0x3]   ;;  %s240_s4 = smov 112   ;;  %s140_s5 = smov 3 }
   0xe   :  { %16 = vrot.lane.b32.xlu0 %v15_v3, %s227_s9  ;;  %v39_v6 = vld [vmem:[#allocation0] sm:$0x3]   ;;  %s148_s6 = smov 3  ;;  %s241_s8 = smov 111  }
   0xf   :  { %28 = vrot.lane.b32.xlu1 %v27_v4, %s228_s10  ;;  %v45_v7 = vld [vmem:[#allocation0] sm:$0x3]   ;;  %s242_s9 = smov 110   ;;  %s156_s10 = smov 3 }
  0x10   :  { %v53_v8 = vld [vmem:[#allocation0 + $0x1] ss:$-1 sm:%s52_s11]   ;;  %s164_s11 = smov 3 }
  0x11   :  { %v61_v9 = vld [vmem:[#allocation0 + $0x1] ss:$-1 sm:%s60_s14]   ;;  %s172_s14 = smov 3 }
  0x12   :  { %34 = vrot.lane.b32.xlu0 %v33_v5, %s229_s12  ;;  %v69_v10 = vld [vmem:[#allocation0 + $0x1] ss:$-1 sm:%s68_s15]   ;;  %s243_s12 = smov 109   ;;  %s245_s15 = smov 107  }
  0x13   :  { %40 = vrot.lane.b32.xlu1 %v39_v6, %s230_s13  ;;  %v77_v11 = vld [vmem:[#allocation0 + $0x1] ss:$-1 sm:%s76_s18]   ;;  %s244_s13 = smov 108  }
  0x14   :  { %v85_v12 = vld [vmem:[#allocation0 + $0x1] ss:$-1 sm:%s84_s19]  }
  0x15   :  { %v93_v13 = vld [vmem:[#allocation0 + $0x1] ss:$-1 sm:%s92_s22]  }
  0x16   :  { %46 = vrot.lane.b32.xlu0 %v45_v7, %s231_s16  ;;  %v101_v14 = vld [vmem:[#allocation0 + $0x1] ss:$-1 sm:%s100_s23]   ;;  %s246_s16 = smov 106  }
  0x17   :  { %54 = vrot.lane.b32.xlu1 %v53_v8, %s232_s17  ;;  %v109_v15 = vld [vmem:[#allocation0 + $0x1] ss:$-1 sm:%s108_s26]   ;;  %s247_s17 = smov 105  }
  0x18   :  { %v117_v16 = vld [vmem:[#allocation0 + $0x1] ss:$-1 sm:%s116_s27]  }
  0x19   :  { %v125_v17 = vld [vmem:[#allocation0 + $0x1] ss:$-1 sm:%s124_s30]  }
  0x1a   :  { %62 = vrot.lane.b32.xlu0 %v61_v9, %s233_s20  ;;  %v133_v18 = vld [vmem:[#allocation0 + $0x1] ss:$-1 sm:%s132_s2]  }
  0x1b   :  { %70 = vrot.lane.b32.xlu1 %v69_v10, %s234_s21  ;;  %v6_v19 = vld [vmem:[#allocation0] sm:$0x3]  }
  0x1c   :  { %8 = vst.msk [vmem:[%s358_s1] ss:$24 sm:$0x3] %vm7_vm0, %v6_v19   ;;  %v141_v20 = vld [vmem:[#allocation0 + $0x1] ss:$-1 sm:%s140_s5]  }
  0x1d   :  { %v149_v21 = vld [vmem:[#allocation0 + $0x1] ss:$-1 sm:%s148_s6]  }
  0x1e   :  { %78 = vrot.lane.b32.xlu0 %v77_v11, %s235_s24  ;;  %v157_v22 = vld [vmem:[#allocation0 + $0x1] ss:$-1 sm:%s156_s10]  }
  0x1f   :  { %86 = vrot.lane.b32.xlu1 %v85_v12, %s236_s25  ;;  %v165_v23 = vld [vmem:[#allocation0 + $0x1] ss:$-1 sm:%s164_s11]  }
  0x20   :  { %v173_v24 = vld [vmem:[#allocation0 + $0x1] ss:$-1 sm:%s172_s14]  }
  0x22   :  { %94 = vrot.lane.b32.xlu0 %v93_v13, %s237_s28 }
  0x23   :  { %102 = vrot.lane.b32.xlu1 %v101_v14, %s238_s29 }
  0x26   :  { %110 = vrot.lane.b32.xlu0 %v109_v15, %s239_s3 }
  0x27   :  { %118 = vrot.lane.b32.xlu1 %v117_v16, %s240_s4 }
  0x2a   :  { %126 = vrot.lane.b32.xlu0 %v125_v17, %s241_s8 }
  0x2b   :  { %134 = vrot.lane.b32.xlu1 %v133_v18, %s242_s9 }
  0x2e   :  { %142 = vrot.lane.b32.xlu0 %v141_v20, %s243_s12 }
  0x2f   :  { %150 = vrot.lane.b32.xlu1 %v149_v21, %s244_s13 }
  0x32   :  { %158 = vrot.lane.b32.xlu0 %v157_v22, %s245_s15 }
  0x33   :  { %166 = vrot.lane.b32.xlu1 %v165_v23, %s246_s16 }
  0x36   :  { %174 = vrot.lane.b32.xlu0 %v173_v24, %s247_s17 }
  0x7c   :  { %v11_v25 = vpop.permute.xlu0 %10  }
  0x7d   :  { %v23_v26 = vpop.permute.xlu1 %22   ;;  %179 = vst.msk [vmem:[%s358_s1 + $0x1] ss:$24 sm:$0x3] %vm7_vm0, %v11_v25  }
  0x7e   :  { %181 = vst.msk [vmem:[%s358_s1 + $0x3] ss:$24 sm:$0x3] %vm7_vm0, %v23_v26  }
  0x80   :  { %v17_v27 = vpop.permute.xlu0 %16  }
  0x81   :  { %v29_v28 = vpop.permute.xlu1 %28   ;;  %180 = vst.msk [vmem:[%s358_s1 + $0x2] ss:$24 sm:$0x3] %vm7_vm0, %v17_v27  }
  0x82   :  { %182 = vst.msk [vmem:[%s358_s1 + $0x4] ss:$24 sm:$0x3] %vm7_vm0, %v29_v28  }
  0x84   :  { %v35_v29 = vpop.permute.xlu0 %34  }
  0x85   :  { %v41_v30 = vpop.permute.xlu1 %40   ;;  %183 = vst.msk [vmem:[%s358_s1 + $0x5] ss:$24 sm:$0x3] %vm7_vm0, %v35_v29  }
  0x86   :  { %184 = vst.msk [vmem:[%s358_s1 + $0x6] ss:$24 sm:$0x3] %vm7_vm0, %v41_v30  }
  0x88   :  { %v47_v31 = vpop.permute.xlu0 %46  }
  0x89   :  { %v55_v32 = vpop.permute.xlu1 %54   ;;  %185 = vst.msk [vmem:[%s358_s1 + $0x7] ss:$24 sm:$0x3] %vm7_vm0, %v47_v31  }
  0x8a   :  { %186 = vst.msk [vmem:[%s358_s1 + $0x20] ss:$-24 sm:$0x3] %vm7_vm0, %v55_v32  }
  0x8c   :  { %v63_v33 = vpop.permute.xlu0 %62  }
  0x8d   :  { %v71_v34 = vpop.permute.xlu1 %70   ;;  %187 = vst.msk [vmem:[%s358_s1 + $0x21] ss:$-24 sm:$0x3] %vm7_vm0, %v63_v33  }
  0x8e   :  { %188 = vst.msk [vmem:[%s358_s1 + $0x22] ss:$-24 sm:$0x3] %vm7_vm0, %v71_v34  }
  0x90   :  { %v79_v35 = vpop.permute.xlu0 %78  }
  0x91   :  { %v87_v36 = vpop.permute.xlu1 %86   ;;  %189 = vst.msk [vmem:[%s358_s1 + $0x23] ss:$-24 sm:$0x3] %vm7_vm0, %v79_v35  }
  0x92   :  { %190 = vst.msk [vmem:[%s358_s1 + $0x24] ss:$-24 sm:$0x3] %vm7_vm0, %v87_v36  }
  0x94   :  { %v95_v37 = vpop.permute.xlu0 %94  }
  0x95   :  { %v103_v38 = vpop.permute.xlu1 %102   ;;  %191 = vst.msk [vmem:[%s358_s1 + $0x25] ss:$-24 sm:$0x3] %vm7_vm0, %v95_v37  }
  0x96   :  { %192 = vst.msk [vmem:[%s358_s1 + $0x26] ss:$-24 sm:$0x3] %vm7_vm0, %v103_v38  }
  0x98   :  { %v111_v39 = vpop.permute.xlu0 %110  }
  0x99   :  { %v119_v40 = vpop.permute.xlu1 %118   ;;  %193 = vst.msk [vmem:[%s358_s1 + $0x27] ss:$-24 sm:$0x3] %vm7_vm0, %v111_v39  }
  0x9a   :  { %194 = vst.msk [vmem:[%s358_s1 + $0x28] ss:$-24 sm:$0x3] %vm7_vm0, %v119_v40  }
  0x9c   :  { %v127_v41 = vpop.permute.xlu0 %126  }
  0x9d   :  { %v135_v42 = vpop.permute.xlu1 %134   ;;  %195 = vst.msk [vmem:[%s358_s1 + $0x29] ss:$-24 sm:$0x3] %vm7_vm0, %v127_v41  }
  0x9e   :  { %196 = vst.msk [vmem:[%s358_s1 + $0x2a] ss:$-24 sm:$0x3] %vm7_vm0, %v135_v42  }
  0xa0   :  { %v143_v43 = vpop.permute.xlu0 %142  }
  0xa1   :  { %v151_v44 = vpop.permute.xlu1 %150   ;;  %197 = vst.msk [vmem:[%s358_s1 + $0x2b] ss:$-24 sm:$0x3] %vm7_vm0, %v143_v43  }
  0xa2   :  { %198 = vst.msk [vmem:[%s358_s1 + $0x2c] ss:$-24 sm:$0x3] %vm7_vm0, %v151_v44  }
  0xa4   :  { %v159_v45 = vpop.permute.xlu0 %158  }
  0xa5   :  { %v167_v46 = vpop.permute.xlu1 %166   ;;  %199 = vst.msk [vmem:[%s358_s1 + $0x2d] ss:$-24 sm:$0x3] %vm7_vm0, %v159_v45  }
  0xa6   :  { %200 = vst.msk [vmem:[%s358_s1 + $0x2e] ss:$-24 sm:$0x3] %vm7_vm0, %v167_v46  }
  0xa8   :  { %v175_v47 = vpop.permute.xlu0 %174  }
  0xa9   :  { %201 = vst.msk [vmem:[%s358_s1 + $0x2f] ss:$-24 sm:$0x3] %vm7_vm0, %v175_v47  }

// kernel: time_step_expansion_forward.1
= control target key start
LH: loop header
LB: loop body
LE: loop exit
PB: predicated region body
PF: predicated region fallthrough
CT: control target
= control target key end

     0   :  { %s3035_s17 = smov 0   ;;  %s3037_s18 = smov 0   ;;  %s3433_s0 = inlined_call_operand.vmem [shape: f32[2,32,64], index: 0, kind: input, shape index: {}]   ;;  %s3434_s1 = inlined_call_operand.vmem [shape: f32[48,32], index: 1, kind: input, shape index: {}]   ;;  %s3435_s2 = inlined_call_operand.vmem [shape: f32[48,1], index: 2, kind: input, shape index: {}]   ;;  %s3436_s3 = inlined_call_operand.vmem [shape: f32[64,48], index: 3, kind: input, shape index: {}]   ;;  %s3437_s4 = inlined_call_operand.vmem [shape: f32[64,1], index: 4, kind: input, shape index: {}]   ;;  %s3438_s5 = inlined_call_operand.vmem [shape: f32[2,4,16], index: 5, kind: input, shape index: {}]   ;;  %s3439_s6 = inlined_call_operand.vmem [shape: f32[2,4,1], index: 6, kind: input, shape index: {}]   ;;  %s3440_s7 = inlined_call_operand.vmem [shape: f32[2,8,4], index: 7, kind: input, shape index: {}]   ;;  %s3441_s8 = inlined_call_operand.vmem [shape: f32[2,8,1], index: 8, kind: input, shape index: {}]   ;;  %s3442_s9 = inlined_call_operand.vmem [shape: f32[2,8,1], index: 9, kind: input, shape index: {}]   ;;  %s3443_s10 = inlined_call_operand.vmem [shape: f32[2,1,1], index: 10, kind: input, shape index: {}]   ;;  %s3444_s11 = inlined_call_operand.vmem [shape: f32[2,4,64], index: 11, kind: output, shape index: {}]  }
   0x1   :  { %s3039_s19 = smov 0  }
   0x2 LB: > { %s33_s20 = sadd.s32 1, %s2965_s18  ;;  %p2533_p0 = scmp.ge.s32.totalorder %s2969_s19, 1  ;;  %s2969_s19 = sphi %s3039_s19, %s21_s19   ;;  %s2965_s18 = sphi %s3037_s18, %s3446_s18   ;;  %s2961_s17 = sphi %s3035_s17, %s3445_s17  }
   0x3   : > { %p35_p1 = scmp.ge.s32.totalorder %s33_s20, 2  ;;  %p356_p2 = scmp.lt.s32.totalorder %s2969_s19, 3 }
   0x5   : > { %s3448_s20 = smov (%p35_p1, %s33_s20), 0  ;;  %p357_p3 = pnand %p2533_p0, %p356_p2 }
   0x6   : > { %p401_p4 = scmp.lt.s32.totalorder (!%p357_p3), %s2961_s17, 1  ;;  %v420_v0 = vld [vmem:[%s3434_s1] sm:$0xff] (!%p357_p3)  ;;  %vm462_vm0 = vcmask (!%p357_p3), 261120   ;;  %v2971_v1 = vmov (!%p357_p3), 0   ;;  %v428_v3 = vld [vmem:[%s3435_s2 + $0x10] sm:$0xff] (!%p357_p3)  ;;  %v427_v4 = vld [vmem:[%s3435_s2 + $0x8] sm:$0xff] (!%p357_p3) }
   0x7   : > { %360 = sbr.rel (%p357_p3) target bundleno = 1349 (0x545), region = 64  ;;  %2664 = vmatprep.mubr.msk.f32.mxu0 (!%p357_p3), %vm462_vm0, %v420_v0  ;;  %2865 = vset.pattern.permute.xlu0 (!%p357_p3), %v2971_v1  ;;  %v426_v2 = vld [vmem:[%s3435_s2] sm:$0xff] (!%p357_p3)  ;;  %v429_v5 = vld [vmem:[%s3435_s2 + $0x18] sm:$0xff] (!%p357_p3)  ;;  %v431_v13 = vld [vmem:[%s3435_s2 + $0x28] sm:$0xff] (!%p357_p3)  ;;  %vm662_vm1 = vcmask (!%p357_p3), 392192   ;;  %vm2973_vm2 = vmmov (!%p357_p3), 0  }
   0x8   : > { %2866 = vset.pattern.permute.xlu1 (!%p357_p3), %v2971_v1  ;;  %434 = vperm.xlu0 (!%p357_p3), %2865, %v426_v2   ;;  %v430_v12 = vld [vmem:[%s3435_s2 + $0x20] sm:$0xff] (!%p357_p3)  ;;  %v615_v15 = vld [vmem:[%s3437_s4 + $0x8] sm:$0xff] (!%p357_p3)  ;;  %v422_v17 = vld [vmem:[%s3434_s1 + $0x10] sm:$0xff] (!%p357_p3)  ;;  %vm861_vm3 = vcmask (!%p357_p3), 130048   ;;  %vm935_vm4 = vcmask (!%p357_p3), 519168   ;;  %vm964_vm5 = vcmask (!%p357_p3), 1043456  }
   0x9   : > { %444 = vperm.xlu1 (!%p357_p3), %2866, %v428_v3   ;;  %v614_v14 = vld [vmem:[%s3437_s4] sm:$0xff] (!%p357_p3)  ;;  %v421_v16 = vld [vmem:[%s3434_s1 + $0x8] sm:$0xff] (!%p357_p3)  ;;  %v616_v19 = vld [vmem:[%s3437_s4 + $0x10] sm:$0xff] (!%p357_p3)  ;;  %vm960_vm6 = vcmask (!%p357_p3), 31744   ;;  %vm1061_vm8 = vcmask (!%p357_p3), 523264  }
   0xa   : > { %v833_v18 = vld [vmem:[%s3439_s6] sm:$0xf] (!%p357_p3)  ;;  %v423_v20 = vld [vmem:[%s3434_s1 + $0x18] sm:$0xff] (!%p357_p3)  ;;  %v425_v24 = vld [vmem:[%s3434_s1 + $0x28] sm:$0xff] (!%p357_p3) }
   0xb   : > { %v424_v21 = vld [vmem:[%s3434_s1 + $0x20] sm:$0xff] (!%p357_p3)  ;;  %v617_v22 = vld [vmem:[%s3437_s4 + $0x18] sm:$0xff] (!%p357_p3)  ;;  %v619_v25 = vld [vmem:[%s3437_s4 + $0x28] sm:$0xff] (!%p357_p3) }
   0xc   : > { %439 = vperm.xlu0 (!%p357_p3), %2865, %v427_v4   ;;  %v618_v23 = vld [vmem:[%s3437_s4 + $0x20] sm:$0xff] (!%p357_p3)  ;;  %v620_v26 = vld [vmem:[%s3437_s4 + $0x30] sm:$0xff] (!%p357_p3)  ;;  %v621_v27 = vld [vmem:[%s3437_s4 + $0x38] sm:$0xff] (!%p357_p3) }
   0xd   : > { %449 = vperm.xlu1 (!%p357_p3), %2866, %v429_v5   ;;  %v2552_v28 = vld [vmem:[%s3439_s6 + $0x4] sm:$0xf] (!%p357_p3)  ;;  %v2554_v30 = vld [vmem:[%s3441_s8 + $0x8] sm:$0xff] (!%p357_p3)  ;;  %v837_v33 = vld [vmem:[%s3443_s10] sm:$0x1] (!%p357_p3) }
   0xe   : > { %s3450_s17 = smov (!%p401_p4, %s2961_s17), 1  ;;  %v835_v29 = vld [vmem:[%s3441_s8] sm:$0xff]  ;;  %v2555_v32 = vld [vmem:[%s3442_s9 + $0x8] sm:$0xff] }
   0xf   : > { %s2591_s27 = sshll.u32 %s3450_s17, 5  ;;  %v836_v31 = vld [vmem:[%s3442_s9] sm:$0xff]  ;;  %s2536_s30 = sshll.u32 %s3450_s17, 2 }
  0x10   : > { %s408_s15 = scalar_lea.vmem %s3433_s0, %s2591_s27  ;;  %454 = vperm.xlu0 %2865, %v430_v12   ;;  %v2556_v34 = vld [vmem:[%s3443_s10 + $0x1] sm:$0x1]  ;;  %s415_s14 = scalar_lea.vmem %s3444_s11, %s2536_s30 }
  0x11   : > { %v416_v6 = vld [vmem:[%s408_s15] sm:$0xff]  ;;  %v417_v7 = vld [vmem:[%s408_s15 + $0x8] sm:$0xff]  ;;  %v418_v8 = vld [vmem:[%s408_s15 + $0x10] sm:$0xff]  ;;  %459 = vperm.xlu1 %2866, %v431_v13  }
  0x12   : > { %v2793_v9 = vpack.c.bf16 %v417_v7, %v416_v6  ;;  %v419_v10 = vld [vmem:[%s408_s15 + $0x18] sm:$0xff]  ;;  %v606_v35 = vld [vmem:[%s3436_s3] sm:$0xff] }
  0x13   : > { %v2797_v11 = vpack.c.bf16 %v419_v10, %v418_v8  ;;  %2685 = vmatprep.mubr.msk.f32.mxu1 %vm662_vm1, %v606_v35 }
  0x14   : > { %2794 = vmatprep.subr.bf16.mxu0 %v2793_v9  ;;  %624 = vperm.xlu0 %2865, %v614_v14  }
  0x15   : > { %2796 = vmatpush3.bf16.msra.mxu0 %v2793_v9  ;;  %629 = vperm.xlu1 %2866, %v615_v15  }
  0x16   : > { %2798 = vmatprep.subr.bf16.mxu0 %v2797_v11 }
  0x18   : > { %858 = vperm.xlu0 %2865, %v833_v18  }
  0x19   : > { %2800 = vmatpush3.bf16.msra.mxu0 %v2797_v11  ;;  %634 = vperm.xlu1 %2866, %v616_v19  }
  0x1c   : > { %2665 = vmatmul.mubr.msk.f32.vlgmr.msra.gmra.mrb[0].mxu0 %vm462_vm0, %v421_v16  ;;  %639 = vperm.xlu0 %2865, %v617_v22  }
  0x1d   : > { %2667 = vmatprep.mubr.msk.f32.mxu0 %vm462_vm0, %v422_v17  ;;  %644 = vperm.xlu1 %2866, %v618_v23   ;;  %v607_v23 = vld [vmem:[%s3436_s3 + $0x8] sm:$0xff] }
  0x20   : > { %2668 = vmatmul.mubr.msk.f32.gmra.mrb[2].mxu0 %vm462_vm0, %v423_v20  ;;  %649 = vperm.xlu0 %2865, %v619_v25   ;;  %v609_v25 = vld [vmem:[%s3436_s3 + $0x18] sm:$0xff] }
  0x21   : > { %2670 = vmatprep.mubr.msk.f32.mxu0 %vm462_vm0, %v424_v21  ;;  %654 = vperm.xlu1 %2866, %v620_v26   ;;  %v610_v26 = vld [vmem:[%s3436_s3 + $0x20] sm:$0xff] }
  0x24   : > { %2671 = vmatmul.mubr.msk.f32.gmra.mrb[4].mxu0 %vm462_vm0, %v425_v24  ;;  %659 = vperm.xlu0 %2865, %v621_v27   ;;  %v608_v24 = vld [vmem:[%s3436_s3 + $0x10] sm:$0xff]  ;;  %v611_v27 = vld [vmem:[%s3436_s3 + $0x28] sm:$0xff] }
  0x25   : > { %1083 = vperm.xlu1 %2866, %v2552_v28   ;;  %v612_v28 = vld [vmem:[%s3436_s3 + $0x30] sm:$0xff] }
  0x28   : > { %957 = vperm.xlu0 %2865, %v835_v29   ;;  %v613_v29 = vld [vmem:[%s3436_s3 + $0x38] sm:$0xff] }
  0x29   : > { %1180 = vperm.xlu1 %2866, %v2554_v30   ;;  %v2972_v30 = vmov 0.0|0.0  }
  0x2a   : > { %2813 = vmatprep.subr.bf16.mxu0 %v2972_v30 }
  0x2c   : > { %1057 = vperm.xlu0 %2865, %v836_v31   ;;  %v2974_v31 = vmov 0.0  }
  0x2d   : > { %1278 = vperm.xlu1 %2866, %v2555_v32   ;;  %2701 = vmatprep.mubr.msk.f32.mxu0 %vm2973_vm2, %v2974_v31 }
  0x30   : > { %1071 = vperm.xlu0 %2865, %v837_v33  }
  0x31   : > { %1291 = vperm.xlu1 %2866, %v2556_v34  }
  0x87   : > { %v435_v36 = vpop.permute.xlu0 %434 }
  0x88   : > { %v445_v37 = vpop.permute.xlu1 %444 }
  0x8b   : > { %v440_v38 = vpop.permute.xlu0 %439 }
  0x8c   : > { %v450_v42 = vpop.permute.xlu1 %449 }
  0x8f   : > { %v455_v58 = vpop.permute.xlu0 %454 }
  0x90   : > { %v460_v54 = vpop.permute.xlu1 %459 }
  0x93   : > { %v625_v32 = vpop.permute.xlu0 %624 }
  0x94   : > { %v630_v34 = vpop.permute.xlu1 %629 }
  0x97   : > { %v3187_v33 = vpop.permute.xlu0 %858 }
  0x9b   : > { %v640_v35 = vpop.permute.xlu0 %639 }
  0xef   : > { %v2666_v39 = vpop.f32.mrb[0].mxu0 }
  0xf0   : > { %v553_v40 = vadd.f32 %v2666_v39, %v440_v38  ;;  %v547_v41 = vpop.f32.mrb[1].mxu0 }
  0xf1   : > { %v548_v43 = vadd.f32 %v547_v41, %v435_v36 }
  0xf2   : > { %v577_v44 = vadd.f32 3.0, %v553_v40 }
  0xf3   : > { %v576_v45 = vadd.f32 3.0, %v548_v43  ;;  %v2669_v46 = vpop.f32.mrb[2].mxu0 }
  0xf4   : > { %v583_v47 = vmax.f32 %v577_v44, 0.0  ;;  %v563_v48 = vadd.f32 %v2669_v46, %v450_v42  ;;  %v557_v49 = vpop.f32.mrb[3].mxu0 }
  0xf5   : > { %v582_v50 = vmax.f32 %v576_v45, 0.0  ;;  %v558_v51 = vadd.f32 %v557_v49, %v445_v37  ;;  %v635_v37 = vpop.permute.xlu1 %634 }
  0xf6   : > { %v589_v52 = vmin.f32 %v583_v47, 6.0  ;;  %v579_v53 = vadd.f32 3.0, %v563_v48  ;;  %v650_v47 = vpop.permute.xlu0 %649 }
  0xf7   : > { %v588_v55 = vmin.f32 %v582_v50, 6.0  ;;  %v578_v56 = vadd.f32 3.0, %v558_v51  ;;  %v2672_v57 = vpop.f32.mrb[4].mxu0 }
  0xf8   : > { %v595_v59 = vmul.f32 %v589_v52, %v553_v40  ;;  %v585_v60 = vmax.f32 %v579_v53, 0.0  ;;  %v573_v61 = vadd.f32 %v2672_v57, %v460_v54  ;;  %v567_v62 = vpop.f32.mrb[5].mxu0 }
  0xf9   : > { %v594_v63 = vmul.f32 %v588_v55, %v548_v43  ;;  %v584_v0 = vmax.f32 %v578_v56, 0.0  ;;  %v568_v1 = vadd.f32 %v567_v62, %v455_v58  ;;  %v645_v50 = vpop.permute.xlu1 %644 }
  0xfa   : > { %v601_v2 = vmul.f32 0.16666667, %v595_v59  ;;  %v591_v3 = vmin.f32 %v585_v60, 6.0  ;;  %v581_v4 = vadd.f32 3.0, %v573_v61 }
  0xfb   : > { %v600_v5 = vmul.f32 0.16666667, %v594_v63  ;;  %v590_v6 = vmin.f32 %v584_v0, 6.0  ;;  %v580_v7 = vadd.f32 3.0, %v568_v1 }
  0xfc   : > { %v597_v8 = vmul.f32 %v591_v3, %v563_v48  ;;  %v587_v9 = vmax.f32 %v581_v4, 0.0 }
  0xfd   : > { %v596_v10 = vmul.f32 %v590_v6, %v558_v51  ;;  %v586_v11 = vmax.f32 %v580_v7, 0.0  ;;  %v2801_v12 = vpack.c.bf16 %v601_v2, %v600_v5  ;;  %v660_v2 = vpop.permute.xlu0 %659  ;;  %v655_v7 = vpop.permute.xlu1 %654 }
  0xfe   : > { %v603_v13 = vmul.f32 0.16666667, %v597_v8  ;;  %v593_v14 = vmin.f32 %v587_v9, 6.0 }
  0xff   : > { %v602_v15 = vmul.f32 0.16666667, %v596_v10  ;;  %v592_v16 = vmin.f32 %v586_v11, 6.0  ;;  %2802 = vmatprep.subr.bf16.mxu1 %v2801_v12 }
 0x100   : > { %v599_v17 = vmul.f32 %v593_v14, %v573_v61  ;;  %2804 = vmatpush3.bf16.msra.mxu1 %v2801_v12 }
 0x101   : > { %v598_v18 = vmul.f32 %v592_v16, %v568_v1  ;;  %v2805_v19 = vpack.c.bf16 %v603_v13, %v602_v15 }
 0x102   : > { %v605_v20 = vmul.f32 0.16666667, %v599_v17 }
 0x103   : > { %v604_v21 = vmul.f32 0.16666667, %v598_v18  ;;  %2806 = vmatprep.subr.bf16.mxu1 %v2805_v19 }
 0x104   : > { %2808 = vmatpush3.bf16.msra.mxu1 %v2805_v19  ;;  %v3192_v19 = vld [vmem:[%s3438_s5] sm:$0xf] }
 0x105   : > { %v2809_v22 = vpack.c.bf16 %v605_v20, %v604_v21 }
 0x107   : > { %2810 = vmatprep.subr.bf16.mxu1 %v2809_v22 }
 0x108   : > { %2812 = vmatpush3.bf16.msra.mxu1 %v2809_v22 }
 0x109   : > { %2716 = vmatprep.subr.mxu1 %v2974_v31 }
 0x10b   : > { %2686 = vmatmul.mubr.msk.f32.vlgmr.msra.gmra.mrb[0].mxu1 %vm662_vm1, %v607_v23 }
 0x10c   : > { %2688 = vmatprep.mubr.msk.f32.mxu1 %vm662_vm1, %v608_v24 }
 0x10f   : > { %2689 = vmatmul.mubr.msk.f32.gmra.mrb[2].mxu1 %vm662_vm1, %v609_v25 }
 0x110   : > { %2691 = vmatprep.mubr.msk.f32.mxu1 %vm662_vm1, %v610_v26 }
 0x113   : > { %2692 = vmatmul.mubr.msk.f32.gmra.mrb[4].mxu1 %vm662_vm1, %v611_v27 }
 0x114   : > { %2694 = vmatprep.mubr.msk.f32.mxu1 %vm662_vm1, %v612_v28 }
 0x117   : > { %2695 = vmatmul.mubr.msk.f32.gmra.mrb[6].mxu1 %vm662_vm1, %v613_v29  ;;  %vm2445_vm1 = vcmask 1040384  }
 0x118   : > { %2718 = vmatprep.mubr.msk.f32.mxu1 %vm2973_vm2, %v2974_v31 }
 0x1de   : > { %v2687_v36 = vpop.f32.mrb[0].mxu1 }
 0x1df   : > { %v759_v38 = vadd.f32 %v2687_v36, %v630_v34  ;;  %v753_v39 = vpop.f32.mrb[1].mxu1 }
 0x1e0   : > { %v754_v40 = vadd.f32 %v753_v39, %v625_v32 }
 0x1e1   : > { %v793_v41 = vadd.f32 3.0, %v759_v38 }
 0x1e2   : > { %v792_v42 = vadd.f32 3.0, %v754_v40  ;;  %v2690_v43 = vpop.f32.mrb[2].mxu1 }
 0x1e3   : > { %v801_v44 = vmax.f32 %v793_v41, 0.0  ;;  %v769_v45 = vadd.f32 %v2690_v43, %v640_v35  ;;  %v763_v46 = vpop.f32.mrb[3].mxu1 }
 0x1e4   : > { %v800_v48 = vmax.f32 %v792_v42, 0.0  ;;  %v764_v49 = vadd.f32 %v763_v46, %v635_v37 }
 0x1e5   : > { %v809_v51 = vmin.f32 %v801_v44, 6.0  ;;  %v795_v52 = vadd.f32 3.0, %v769_v45 }
 0x1e6   : > { %v808_v53 = vmin.f32 %v800_v48, 6.0  ;;  %v794_v54 = vadd.f32 3.0, %v764_v49  ;;  %v2693_v55 = vpop.f32.mrb[4].mxu1 }
 0x1e7   : > { %v817_v56 = vmul.f32 %v809_v51, %v759_v38  ;;  %v803_v57 = vmax.f32 %v795_v52, 0.0  ;;  %v779_v58 = vadd.f32 %v2693_v55, %v650_v47  ;;  %v773_v59 = vpop.f32.mrb[5].mxu1 }
 0x1e8   : > { %v816_v60 = vmul.f32 %v808_v53, %v754_v40  ;;  %v802_v61 = vmax.f32 %v794_v54, 0.0  ;;  %v774_v62 = vadd.f32 %v773_v59, %v645_v50 }
 0x1e9   : > { %v825_v63 = vmul.f32 0.16666667, %v817_v56  ;;  %v811_v0 = vmin.f32 %v803_v57, 6.0  ;;  %v797_v1 = vadd.f32 3.0, %v779_v58 }
 0x1ea   : > { %v824_v3 = vmul.f32 0.16666667, %v816_v60  ;;  %v810_v4 = vmin.f32 %v802_v61, 6.0  ;;  %v796_v5 = vadd.f32 3.0, %v774_v62  ;;  %v2696_v6 = vpop.f32.mrb[6].mxu1 }
 0x1eb   : > { %v819_v8 = vmul.f32 %v811_v0, %v769_v45  ;;  %v805_v9 = vmax.f32 %v797_v1, 0.0  ;;  %v789_v10 = vadd.f32 %v2696_v6, %v660_v2  ;;  %v783_v11 = vpop.f32.mrb[7].mxu1  ;;  %v2551_v0 = vld [vmem:[%s3438_s5 + $0x4] sm:$0xf] }
 0x1ec   : > { %v2814_v12 = vpack.c.bf16 %v825_v63, %v824_v3  ;;  %v818_v13 = vmul.f32 %v810_v4, %v764_v49  ;;  %v804_v14 = vmax.f32 %v796_v5, 0.0  ;;  %v784_v15 = vadd.f32 %v783_v11, %v655_v7  ;;  %v3205_v63 = vld [vmem:[%s3440_s7] sm:$0xff]  ;;  %v1084_v3 = vpop.permute.xlu1 %1083 }
 0x1ed   : > { %v827_v16 = vmul.f32 0.16666667, %v819_v8  ;;  %v813_v17 = vmin.f32 %v805_v9, 6.0  ;;  %v799_v18 = vadd.f32 3.0, %v789_v10 }
 0x1ee   : > { %v826_v20 = vmul.f32 0.16666667, %v818_v13  ;;  %v812_v21 = vmin.f32 %v804_v14, 6.0  ;;  %v798_v22 = vadd.f32 3.0, %v784_v15  ;;  %2815 = vmatpush3.bf16.msra.mxu0 %v2814_v12 }
 0x1ef   : > { %v821_v23 = vmul.f32 %v813_v17, %v779_v58  ;;  %v807_v24 = vmax.f32 %v799_v18, 0.0  ;;  %2704 = vmatprep.subr.mxu0 %v2974_v31 }
 0x1f0   : > { %v2820_v25 = vpack.c.bf16 %v827_v16, %v826_v20  ;;  %v820_v26 = vmul.f32 %v812_v21, %v774_v62  ;;  %v806_v27 = vmax.f32 %v798_v22, 0.0 }
 0x1f1   : > { %v829_v28 = vmul.f32 0.16666667, %v821_v23  ;;  %v815_v29 = vmin.f32 %v807_v24, 6.0  ;;  %2702 = vmatmul.mubr.msk.f32.vlgmr.msra.gmra.mrb[6].mxu0 %vm861_vm3, %v3192_v19 }
 0x1f2   : > { %v828_v32 = vmul.f32 0.16666667, %v820_v26  ;;  %v814_v34 = vmin.f32 %v806_v27, 6.0  ;;  %2706 = vmatprep.mubr.msk.f32.mxu0 %vm2973_vm2, %v2974_v31 }
 0x1f3   : > { %v823_v35 = vmul.f32 %v815_v29, %v789_v10 }
 0x1f4   : > { %v2826_v36 = vpack.c.bf16 %v829_v28, %v828_v32  ;;  %v822_v37 = vmul.f32 %v814_v34, %v784_v15 }
 0x1f5   : > { %v831_v38 = vmul.f32 0.16666667, %v823_v35 }
 0x1f6   : > { %v830_v39 = vmul.f32 0.16666667, %v822_v37 }
 0x1f8   : > { %v2832_v40 = vpack.c.bf16 %v831_v38, %v830_v39 }
 0x2c4   : > { %v931_v41 = vpop.f32.mrb[6].mxu0 }
 0x2c5   : > { %v932_v42 = vadd.f32 %v931_v41, %v3187_v33  ;;  %v2703_v43 = vpop.f32.mrb[7].mxu0 }
 0x2c7   : > { %v936_v44 = vsel %vm935_vm4, %v932_v42, -inf }
 0x2c8   : > { %v937_v45 = vrot.slane %v936_v44, 4 }
 0x2ca   : > { %v938_v46 = vmax.f32 %v936_v44, %v937_v45 }
 0x2cc   : > { %v939_v47 = vrot.slane %v938_v46, 2 }
 0x2ce   : > { %v940_v48 = vmax.f32 %v938_v46, %v939_v47 }
 0x2d0   : > { %v941_v49 = vrot.slane %v940_v48, 1 }
 0x2d2   : > { %v942_v50 = vmax.f32 %v940_v48, %v941_v49 }
 0x2d4   : > { %v943_v51 = vsub.f32 %v932_v42, %v942_v50 }
 0x2d6   : > { %v944_v52 = vmul.f32 1.442695, %v943_v51 }
 0x2d8   : > { %2867 = vpow2.f32 %v944_v52 }
 0x2e2   : > { %v2868_v53 = vpop.eup %2867 }
 0x2e3   : > { %v946_v54 = vsel %vm935_vm4, %v2868_v53, 0.0 }
 0x2e4   : > { %v947_v55 = vrot.slane %v946_v54, 4 }
 0x2e6   : > { %v948_v56 = vadd.f32 %v947_v55, %v946_v54 }
 0x2e8   : > { %v949_v57 = vrot.slane %v948_v56, 2 }
 0x2ea   : > { %v950_v58 = vadd.f32 %v949_v57, %v948_v56 }
 0x2ec   : > { %v951_v59 = vrot.slane %v950_v58, 1 }
 0x2ee   : > { %v952_v60 = vadd.f32 %v951_v59, %v950_v58 }
 0x2f0   : > { %2869 = vrcp.f32 %v952_v60 }
 0x2fa   : > { %v2870_v61 = vpop.eup %2869 }
 0x2fb   : > { %v954_v62 = vmul.f32 %v2870_v61, %v2868_v53 }
 0x2fd   : > { %2705 = vmatpush3.msk.msra.mxu0 %vm964_vm5, %v954_v62 }
 0x2fe   : > { %2707 = vmatmul.mubr.msk.f32.vlgmr.msra.gmra.mrb[8].mxu0 %vm960_vm6, %v3205_v63  ;;  %2816 = vmatprep.subr.bf16.mxu0 %v2972_v30 }
 0x2ff   : > { %2818 = vmatpush3.bf16.msra.mxu0 %v2814_v12  ;;  %2713 = vmatprep.mubr.msk.f32.mxu0 %vm2973_vm2, %v2974_v31 }
 0x300   : > { %2819 = vmatprep.subr.bf16.mxu0 %v2972_v30 }
 0x302   : > { %2714 = vmatmul.mubr.msk.f32.vlgmr.msra.gmra.mrb[10].mxu0 %vm861_vm3, %v2551_v0 }
 0x303   : > { %2821 = vmatpush3.bf16.msra.mxu0 %v2820_v25  ;;  %2725 = vmatprep.mubr.msk.f32.mxu0 %vm2973_vm2, %v2974_v31 }
 0x304   : > { %2822 = vmatprep.subr.bf16.mxu0 %v2972_v30 }
 0x306   : > { %2726 = vmatmul.mubr.msk.f32.vlgmr.msra.gmra.mrb[12].mxu0 %vm861_vm3, %v3192_v19 }
 0x307   : > { %2824 = vmatpush3.bf16.msra.mxu0 %v2820_v25  ;;  %2737 = vmatprep.mubr.msk.f32.mxu0 %vm2973_vm2, %v2974_v31 }
 0x308   : > { %2825 = vmatprep.subr.bf16.mxu0 %v2972_v30 }
 0x30a   : > { %2738 = vmatmul.mubr.msk.f32.vlgmr.msra.gmra.mrb[14].mxu0 %vm861_vm3, %v2551_v0 }
 0x30b   : > { %2827 = vmatpush3.bf16.msra.mxu0 %v2826_v36  ;;  %2749 = vmatprep.mubr.msk.f32.mxu0 %vm2973_vm2, %v2974_v31 }
 0x30c   : > { %2828 = vmatprep.subr.bf16.mxu0 %v2972_v30 }
 0x30e   : > { %2750 = vmatmul.mubr.msk.f32.vlgmr.msra.gmra.mrb[16].mxu0 %vm861_vm3, %v3192_v19 }
 0x30f   : > { %2830 = vmatpush3.bf16.msra.mxu0 %v2826_v36  ;;  %2761 = vmatprep.mubr.msk.f32.mxu0 %vm2973_vm2, %v2974_v31 }
 0x310   : > { %2831 = vmatprep.subr.bf16.mxu0 %v2972_v30 }
 0x312   : > { %2762 = vmatmul.mubr.msk.f32.vlgmr.msra.gmra.mrb[18].mxu0 %vm861_vm3, %v2551_v0 }
 0x313   : > { %2833 = vmatpush3.bf16.msra.mxu0 %v2832_v40  ;;  %2773 = vmatprep.mubr.msk.f32.mxu0 %vm2973_vm2, %v2974_v31 }
 0x314   : > { %2834 = vmatprep.subr.bf16.mxu0 %v2972_v30 }
 0x316   : > { %2774 = vmatmul.mubr.msk.f32.vlgmr.msra.gmra.mrb[20].mxu0 %vm861_vm3, %v3192_v19 }
 0x317   : > { %2836 = vmatpush3.bf16.msra.mxu0 %v2832_v40  ;;  %2785 = vmatprep.mubr.msk.f32.mxu0 %vm2973_vm2, %v2974_v31 }
 0x31a   : > { %2786 = vmatmul.mubr.msk.f32.vlgmr.msra.gmra.mrb[22].mxu0 %vm861_vm3, %v2551_v0  ;;  %vm2449_vm3 = vcmask 1042432  }
 0x3d1   : > { %v3244_v1 = vpop.f32.mrb[8].mxu0 }
 0x3d2   : > { %v2708_v2 = vpop.f32.mrb[9].mxu0 }
 0x3d5   : > { %v1155_v4 = vpop.f32.mrb[10].mxu0 }
 0x3d6   : > { %v1156_v5 = vadd.f32 %v1155_v4, %v1084_v3  ;;  %v2715_v6 = vpop.f32.mrb[11].mxu0 }
 0x3d8   : > { %v1159_v7 = vsel %vm935_vm4, %v1156_v5, -inf }
 0x3d9   : > { %v1160_v8 = vrot.slane %v1159_v7, 4  ;;  %v1368_v30 = vpop.f32.mrb[12].mxu0 }
 0x3da   : > { %v1369_v9 = vadd.f32 %v1368_v30, %v3187_v33  ;;  %v2727_v10 = vpop.f32.mrb[13].mxu0 }
 0x3db   : > { %v1161_v11 = vmax.f32 %v1159_v7, %v1160_v8 }
 0x3dc   : > { %v1372_v12 = vsel %vm935_vm4, %v1369_v9, -inf }
 0x3dd   : > { %v1162_v13 = vrot.slane %v1161_v11, 2  ;;  %v1373_v14 = vrot.slane %v1372_v12, 4  ;;  %v1558_v15 = vpop.f32.mrb[14].mxu0 }
 0x3de   : > { %v1559_v16 = vadd.f32 %v1558_v15, %v1084_v3  ;;  %v2739_v17 = vpop.f32.mrb[15].mxu0 }
 0x3df   : > { %v1163_v18 = vmax.f32 %v1161_v11, %v1162_v13  ;;  %v1374_v19 = vmax.f32 %v1372_v12, %v1373_v14 }
 0x3e0   : > { %v1562_v20 = vsel %vm935_vm4, %v1559_v16, -inf }
 0x3e1   : > { %v1164_v21 = vrot.slane %v1163_v18, 1  ;;  %v1375_v22 = vrot.slane %v1374_v19, 2  ;;  %v1563_v23 = vrot.slane %v1562_v20, 4  ;;  %v1749_v24 = vpop.f32.mrb[16].mxu0 }
 0x3e2   : > { %v1750_v25 = vadd.f32 %v1749_v24, %v3187_v33  ;;  %v2751_v26 = vpop.f32.mrb[17].mxu0 }
 0x3e3   : > { %v1165_v27 = vmax.f32 %v1163_v18, %v1164_v21  ;;  %v1376_v28 = vmax.f32 %v1374_v19, %v1375_v22  ;;  %v1564_v29 = vmax.f32 %v1562_v20, %v1563_v23 }
 0x3e4   : > { %v1753_v32 = vsel %vm935_vm4, %v1750_v25, -inf }
 0x3e5   : > { %v1166_v34 = vsub.f32 %v1156_v5, %v1165_v27  ;;  %v1939_v35 = vpop.f32.mrb[18].mxu0  ;;  %v1377_v36 = vrot.slane %v1376_v28, 1  ;;  %v1565_v37 = vrot.slane %v1564_v29, 2  ;;  %v1754_v38 = vrot.slane %v1753_v32, 4 }
 0x3e6   : > { %v1940_v39 = vadd.f32 %v1939_v35, %v1084_v3  ;;  %v2763_v40 = vpop.f32.mrb[19].mxu0 }
 0x3e7   : > { %v1167_v41 = vmul.f32 1.442695, %v1166_v34  ;;  %v1378_v42 = vmax.f32 %v1376_v28, %v1377_v36  ;;  %v1566_v43 = vmax.f32 %v1564_v29, %v1565_v37  ;;  %v1755_v44 = vmax.f32 %v1753_v32, %v1754_v38 }
 0x3e8   : > { %v1943_v45 = vsel %vm935_vm4, %v1940_v39, -inf }
 0x3e9   : > { %2871 = vpow2.f32 %v1167_v41  ;;  %v1944_v46 = vrot.slane %v1943_v45, 4  ;;  %v2130_v47 = vpop.f32.mrb[20].mxu0  ;;  %v1379_v48 = vsub.f32 %v1369_v9, %v1378_v42  ;;  %v1567_v49 = vrot.slane %v1566_v43, 1 }
 0x3ea   : > { %v1756_v50 = vrot.slane %v1755_v44, 2  ;;  %v2131_v51 = vadd.f32 %v2130_v47, %v3187_v33  ;;  %v2775_v52 = vpop.f32.mrb[21].mxu0 }
 0x3eb   : > { %v1945_v53 = vmax.f32 %v1943_v45, %v1944_v46  ;;  %v1380_v54 = vmul.f32 1.442695, %v1379_v48  ;;  %v1568_v55 = vmax.f32 %v1566_v43, %v1567_v49 }
 0x3ec   : > { %v1757_v56 = vmax.f32 %v1755_v44, %v1756_v50  ;;  %v2134_v57 = vsel %vm935_vm4, %v2131_v51, -inf }
 0x3ed   : > { %v1946_v58 = vrot.slane %v1945_v53, 2  ;;  %v2135_v59 = vrot.slane %v2134_v57, 4  ;;  %v2320_v60 = vpop.f32.mrb[22].mxu0  ;;  %2873 = vpow2.f32 %v1380_v54  ;;  %v1569_v61 = vsub.f32 %v1559_v16, %v1568_v55 }
 0x3ee   : > { %v1758_v62 = vrot.slane %v1757_v56, 1  ;;  %v2321_v0 = vadd.f32 %v2320_v60, %v1084_v3  ;;  %v2787_v2 = vpop.f32.mrb[23].mxu0 }
 0x3ef   : > { %v1947_v4 = vmax.f32 %v1945_v53, %v1946_v58  ;;  %v2136_v5 = vmax.f32 %v2134_v57, %v2135_v59  ;;  %v1570_v6 = vmul.f32 1.442695, %v1569_v61 }
 0x3f0   : > { %v1759_v7 = vmax.f32 %v1757_v56, %v1758_v62  ;;  %v2324_v33 = vsel %vm935_vm4, %v2321_v0, -inf }
 0x3f1   : > { %v1948_v8 = vrot.slane %v1947_v4, 1  ;;  %v2137_v30 = vrot.slane %v2136_v5, 2  ;;  %v2325_v9 = vrot.slane %v2324_v33, 4  ;;  %2875 = vpow2.f32 %v1570_v6 }
 0x3f2   : > { %v1760_v10 = vsub.f32 %v1750_v25, %v1759_v7 }
 0x3f3   : > { %v3256_v11 = vpop.eup %2871  ;;  %v1949_v12 = vmax.f32 %v1947_v4, %v1948_v8  ;;  %v2138_v13 = vmax.f32 %v2136_v5, %v2137_v30  ;;  %v2326_v14 = vmax.f32 %v2324_v33, %v2325_v9  ;;  %v2553_v9 = vld [vmem:[%s3440_s7 + $0x8] sm:$0xff] }
 0x3f4   : > { %v1169_v3 = vsel %vm935_vm4, %v3256_v11, 0.0  ;;  %v1761_v15 = vmul.f32 1.442695, %v1760_v10 }
 0x3f5   : > { %v1170_v16 = vrot.slane %v1169_v3, 4  ;;  %v1950_v17 = vsub.f32 %v1940_v39, %v1949_v12  ;;  %v2139_v18 = vrot.slane %v2138_v13, 1  ;;  %v2327_v19 = vrot.slane %v2326_v14, 2 }
 0x3f6   : > { %2877 = vpow2.f32 %v1761_v15 }
 0x3f7   : > { %v1171_v20 = vadd.f32 %v1170_v16, %v1169_v3  ;;  %v1951_v21 = vmul.f32 1.442695, %v1950_v17  ;;  %v2140_v22 = vmax.f32 %v2138_v13, %v2139_v18  ;;  %v3260_v23 = vpop.eup %2873  ;;  %v2328_v24 = vmax.f32 %v2326_v14, %v2327_v19 }
 0x3f8   : > { %v1382_v26 = vsel %vm935_vm4, %v3260_v23, 0.0 }
 0x3f9   : > { %v1172_v25 = vrot.slane %v1171_v20, 2  ;;  %2879 = vpow2.f32 %v1951_v21  ;;  %v2141_v27 = vsub.f32 %v2131_v51, %v2140_v22  ;;  %v1383_v28 = vrot.slane %v1382_v26, 4 }
 0x3fa   : > { %v2329_v29 = vrot.slane %v2328_v24, 1 }
 0x3fb   : > { %v1173_v32 = vadd.f32 %v1172_v25, %v1171_v20  ;;  %v2142_v34 = vmul.f32 1.442695, %v2141_v27  ;;  %v3264_v35 = vpop.eup %2875  ;;  %v1384_v36 = vadd.f32 %v1383_v28, %v1382_v26 }
 0x3fc   : > { %v2330_v37 = vmax.f32 %v2328_v24, %v2329_v29  ;;  %v1572_v39 = vsel %vm935_vm4, %v3264_v35, 0.0 }
 0x3fd   : > { %v1174_v38 = vrot.slane %v1173_v32, 1  ;;  %2881 = vpow2.f32 %v2142_v34  ;;  %v1385_v40 = vrot.slane %v1384_v36, 2  ;;  %v1573_v41 = vrot.slane %v1572_v39, 4 }
 0x3fe   : > { %v2331_v42 = vsub.f32 %v2321_v0, %v2330_v37 }
 0x3ff   : > { %v1175_v43 = vadd.f32 %v1174_v38, %v1173_v32  ;;  %v1386_v45 = vadd.f32 %v1385_v40, %v1384_v36  ;;  %v1574_v46 = vadd.f32 %v1573_v41, %v1572_v39  ;;  %v958_v39 = vpop.permute.xlu0 %957 }
 0x400   : > { %v3268_v44 = vpop.eup %2877  ;;  %v2332_v47 = vmul.f32 1.442695, %v2331_v42  ;;  %v3322_v40 = vadd.f32 %v3244_v1, %v958_v39 }
 0x401   : > { %2883 = vrcp.f32 %v1175_v43  ;;  %v1763_v48 = vsel %vm935_vm4, %v3268_v44, 0.0  ;;  %v1387_v49 = vrot.slane %v1386_v45, 1  ;;  %v1575_v50 = vrot.slane %v1574_v46, 2 }
 0x402   : > { %v1764_v51 = vrot.slane %v1763_v48, 4  ;;  %2885 = vpow2.f32 %v2332_v47  ;;  %v1038_v41 = vand.u32 2147483647, %v3322_v40  ;;  %v1181_v47 = vpop.permute.xlu1 %1180 }
 0x403   : > { %v3272_v52 = vpop.eup %2879  ;;  %v1388_v53 = vadd.f32 %v1387_v49, %v1386_v45  ;;  %v1576_v54 = vadd.f32 %v1575_v50, %v1574_v46 }
 0x404   : > { %v1765_v55 = vadd.f32 %v1764_v51, %v1763_v48  ;;  %v1953_v56 = vsel %vm935_vm4, %v3272_v52, 0.0  ;;  %v1039_v42 = vsub.f32 0.0, %v1038_v41 }
 0x405   : > { %2887 = vrcp.f32 %v1388_v53  ;;  %v1577_v57 = vrot.slane %v1576_v54, 1  ;;  %v1954_v60 = vrot.slane %v1953_v56, 4 }
 0x406   : > { %v1766_v58 = vrot.slane %v1765_v55, 2  ;;  %v1040_v43 = vmul.f32 1.442695, %v1039_v42 }
 0x407   : > { %v2882_v59 = vpop.eup %2881  ;;  %v1578_v61 = vadd.f32 %v1577_v57, %v1576_v54  ;;  %v1955_v2 = vadd.f32 %v1954_v60, %v1953_v56  ;;  %v1051_v57 = vmax.f32 %v3322_v40, 0.0 }
 0x408   : > { %v1767_v62 = vadd.f32 %v1766_v58, %v1765_v55  ;;  %v2144_v0 = vsel %vm935_vm4, %v2882_v59, 0.0 }
 0x409   : > { %v2145_v4 = vrot.slane %v2144_v0, 4  ;;  %2889 = vrcp.f32 %v1578_v61  ;;  %v1956_v7 = vrot.slane %v1955_v2, 2 }
 0x40a   : > { %v1768_v5 = vrot.slane %v1767_v62, 1 }
 0x40b   : > { %v2884_v6 = vpop.eup %2883  ;;  %v2146_v33 = vadd.f32 %v2145_v4, %v2144_v0  ;;  %v1957_v12 = vadd.f32 %v1956_v7, %v1955_v2 }
 0x40c   : > { %v1769_v8 = vadd.f32 %v1768_v5, %v1767_v62  ;;  %v1177_v30 = vmul.f32 %v2884_v6, %v3256_v11  ;;  %v2886_v10 = vpop.eup %2885 }
 0x40d   : > { %v2147_v13 = vrot.slane %v2146_v33, 2  ;;  %v2334_v14 = vsel %vm935_vm4, %v2886_v10, 0.0  ;;  %v1958_v3 = vrot.slane %v1957_v12, 1 }
 0x40e   : > { %2891 = vrcp.f32 %v1769_v8  ;;  %2717 = vmatpush3.msk.msra.mxu1 %vm964_vm5, %v1177_v30  ;;  %v2335_v16 = vrot.slane %v2334_v14, 4 }
 0x40f   : > { %v2148_v15 = vadd.f32 %v2147_v13, %v2146_v33  ;;  %2719 = vmatmul.mubr.msk.f32.vlgmr.msra.gmra.mrb[8].mxu1 %vm960_vm6, %v2553_v9  ;;  %2728 = vmatprep.subr.mxu1 %v2974_v31  ;;  %v2888_v11 = vpop.eup %2887  ;;  %v1959_v17 = vadd.f32 %v1958_v3, %v1957_v12 }
 0x410   : > { %2730 = vmatprep.mubr.msk.f32.mxu1 %vm2973_vm2, %v2974_v31  ;;  %v2336_v19 = vadd.f32 %v2335_v16, %v2334_v14  ;;  %v1390_v20 = vmul.f32 %v2888_v11, %v3260_v23 }
 0x411   : > { %v2149_v18 = vrot.slane %v2148_v15, 1  ;;  %2893 = vrcp.f32 %v1959_v17 }
 0x412   : > { %v2337_v22 = vrot.slane %v2336_v19, 2  ;;  %2729 = vmatpush3.msk.msra.mxu1 %vm964_vm5, %v1390_v20 }
 0x413   : > { %v2150_v21 = vadd.f32 %v2149_v18, %v2148_v15  ;;  %v2890_v24 = vpop.eup %2889  ;;  %2731 = vmatmul.mubr.msk.f32.vlgmr.msra.gmra.mrb[10].mxu1 %vm960_vm6, %v3205_v63  ;;  %2740 = vmatprep.subr.mxu1 %v2974_v31 }
 0x414   : > { %v2338_v25 = vadd.f32 %v2337_v22, %v2336_v19  ;;  %v1580_v26 = vmul.f32 %v2890_v24, %v3264_v35  ;;  %2742 = vmatprep.mubr.msk.f32.mxu1 %vm2973_vm2, %v2974_v31 }
 0x415   : > { %2895 = vrcp.f32 %v2150_v21 }
 0x416   : > { %v2339_v27 = vrot.slane %v2338_v25, 1  ;;  %2741 = vmatpush3.msk.msra.mxu1 %vm964_vm5, %v1580_v26 }
 0x417   : > { %2752 = vmatprep.subr.mxu1 %v2974_v31  ;;  %2743 = vmatmul.mubr.msk.f32.vlgmr.msra.gmra.mrb[12].mxu1 %vm960_vm6, %v2553_v9 }
 0x418   : > { %v2892_v23 = vpop.eup %2891  ;;  %v2340_v28 = vadd.f32 %v2339_v27, %v2338_v25  ;;  %2754 = vmatprep.mubr.msk.f32.mxu1 %vm2973_vm2, %v2974_v31 }
 0x419   : > { %v1771_v29 = vmul.f32 %v2892_v23, %v3268_v44 }
 0x41a   : > { %2897 = vrcp.f32 %v2340_v28 }
 0x41b   : > { %2753 = vmatpush3.msk.msra.mxu1 %vm964_vm5, %v1771_v29  ;;  %v2894_v32 = vpop.eup %2893  ;;  %2899 = vpow2.f32 %v1040_v43 }
 0x41c   : > { %2764 = vmatprep.subr.mxu1 %v2974_v31  ;;  %2755 = vmatmul.mubr.msk.f32.vlgmr.msra.gmra.mrb[14].mxu1 %vm960_vm6, %v3205_v63  ;;  %v1961_v34 = vmul.f32 %v2894_v32, %v3272_v52 }
 0x41d   : > { %2766 = vmatprep.mubr.msk.f32.mxu1 %vm2973_vm2, %v2974_v31 }
 0x41e   : > { %2765 = vmatpush3.msk.msra.mxu1 %vm964_vm5, %v1961_v34 }
 0x41f   : > { %v2896_v35 = vpop.eup %2895  ;;  %2776 = vmatprep.subr.mxu1 %v2974_v31 }
 0x420   : > { %v2152_v36 = vmul.f32 %v2896_v35, %v2882_v59  ;;  %2767 = vmatmul.mubr.msk.f32.vlgmr.msra.gmra.mrb[16].mxu1 %vm960_vm6, %v2553_v9 }
 0x421   : > { %2778 = vmatprep.mubr.msk.f32.mxu1 %vm2973_vm2, %v2974_v31 }
 0x422   : > { %2777 = vmatpush3.msk.msra.mxu1 %vm964_vm5, %v2152_v36 }
 0x423   : > { %2788 = vmatprep.subr.mxu1 %v2974_v31 }
 0x424   : > { %v2898_v37 = vpop.eup %2897  ;;  %2779 = vmatmul.mubr.msk.f32.vlgmr.msra.gmra.mrb[18].mxu1 %vm960_vm6, %v3205_v63 }
 0x425   : > { %v2342_v38 = vmul.f32 %v2898_v37, %v2886_v10  ;;  %2790 = vmatprep.mubr.msk.f32.mxu1 %vm2973_vm2, %v2974_v31  ;;  %v2900_v44 = vpop.eup %2899  ;;  %vm2447_vm2 = vcmask 1041408  }
 0x426   : > { %v1042_v45 = vadd.f32 1.0, %v2900_v44  ;;  %v1045_v63 = vmul.f32 -0.5, %v2900_v44  ;;  %v1048_v49 = vand.u32 2147483647, %v2900_v44 }
 0x427   : > { %2789 = vmatpush3.msk.msra.mxu1 %vm964_vm5, %v2342_v38  ;;  %v3347_v38 = vpop.permute.xlu0 %1057 }
 0x428   : > { %2791 = vmatmul.mubr.msk.f32.vlgmr.msra.gmra.mrb[20].mxu1 %vm960_vm6, %v2553_v9  ;;  %2901 = vlog2.f32 %v1042_v45  ;;  %v1046_v31 = vadd.f32 1.0, %v1045_v63  ;;  %vm1049_vm7 = vcmp.lt.f32.partialorder %v1048_v49, 0.0004427343 }
 0x42a   : > { %v1047_v53 = vmul.f32 %v2900_v44, %v1046_v31 }
 0x432   : > { %v2902_v46 = vpop.eup %2901 }
 0x433   : > { %v1044_v52 = vmul.f32 0.6931472, %v2902_v46 }
 0x435   : > { %v1050_v55 = vsel %vm1049_vm7, %v1047_v53, %v1044_v52 }
 0x436   : > { %v1052_v61 = vadd.f32 %v1051_v57, %v1050_v55 }
 0x4e2   : > { %v1255_v48 = vpop.f32.mrb[8].mxu1 }
 0x4e3   : > { %v3325_v50 = vadd.f32 %v1255_v48, %v1181_v47  ;;  %v2720_v51 = vpop.f32.mrb[9].mxu1 }
 0x4e5   : > { %v1259_v1 = vand.u32 2147483647, %v3325_v50  ;;  %v1272_v52 = vmax.f32 %v3325_v50, 0.0 }
 0x4e6   : > { %v1460_v56 = vpop.f32.mrb[10].mxu1 }
 0x4e7   : > { %v1260_v54 = vsub.f32 0.0, %v1259_v1  ;;  %v3329_v59 = vadd.f32 %v1460_v56, %v958_v39  ;;  %v2732_v60 = vpop.f32.mrb[11].mxu1 }
 0x4e9   : > { %v1261_v58 = vmul.f32 1.442695, %v1260_v54  ;;  %v1464_v62 = vand.u32 2147483647, %v3329_v59 }
 0x4ea   : > { %v1650_v0 = vpop.f32.mrb[12].mxu1 }
 0x4eb   : > { %2903 = vpow2.f32 %v1261_v58  ;;  %v1465_v2 = vsub.f32 0.0, %v1464_v62  ;;  %v3332_v4 = vadd.f32 %v1650_v0, %v1181_v47  ;;  %v2744_v5 = vpop.f32.mrb[13].mxu1 }
 0x4ec   : > { %2905 = vtanh.f32 %v1052_v61 }
 0x4ed   : > { %v1466_v6 = vmul.f32 1.442695, %v1465_v2  ;;  %v1654_v7 = vand.u32 2147483647, %v3332_v4 }
 0x4ef   : > { %v1841_v33 = vpop.f32.mrb[14].mxu1  ;;  %2907 = vpow2.f32 %v1466_v6  ;;  %v1655_v8 = vsub.f32 0.0, %v1654_v7  ;;  %v1477_v7 = vmax.f32 %v3329_v59, 0.0 }
 0x4f0   : > { %v3335_v30 = vadd.f32 %v1841_v33, %v958_v39  ;;  %v2756_v9 = vpop.f32.mrb[15].mxu1 }
 0x4f1   : > { %v1656_v10 = vmul.f32 1.442695, %v1655_v8 }
 0x4f2   : > { %v1845_v12 = vand.u32 2147483647, %v3335_v30 }
 0x4f3   : > { %v2031_v13 = vpop.f32.mrb[16].mxu1  ;;  %2909 = vpow2.f32 %v1656_v10 }
 0x4f4   : > { %v1846_v3 = vsub.f32 0.0, %v1845_v12  ;;  %v3338_v15 = vadd.f32 %v2031_v13, %v1181_v47  ;;  %v2768_v16 = vpop.f32.mrb[17].mxu1 }
 0x4f5   : > { %v2904_v14 = vpop.eup %2903 }
 0x4f6   : > { %v1263_v11 = vadd.f32 1.0, %v2904_v14  ;;  %v1847_v17 = vmul.f32 1.442695, %v1846_v3  ;;  %v2035_v18 = vand.u32 2147483647, %v3338_v15  ;;  %v2906_v20 = vpop.eup %2905  ;;  %v1266_v26 = vmul.f32 -0.5, %v2904_v14 }
 0x4f7   : > { %v2222_v19 = vpop.f32.mrb[18].mxu1  ;;  %v1054_v28 = vmul.f32 %v2906_v20, %v3322_v40  ;;  %v1269_v44 = vand.u32 2147483647, %v2904_v14 }
 0x4f8   : > { %2911 = vlog2.f32 %v1263_v11  ;;  %v2036_v21 = vsub.f32 0.0, %v2035_v18  ;;  %v3341_v22 = vadd.f32 %v2222_v19, %v958_v39  ;;  %v2780_v24 = vpop.f32.mrb[19].mxu1  ;;  %v1267_v39 = vadd.f32 1.0, %v1266_v26 }
 0x4f9   : > { %2913 = vpow2.f32 %v1847_v17  ;;  %v2908_v25 = vpop.eup %2907  ;;  %v1060_v43 = vmul.f32 %v3347_v38, %v1054_v28  ;;  %vm1270_vm9 = vcmp.lt.f32.partialorder %v1269_v44, 0.0004427343  ;;  %v1667_v18 = vmax.f32 %v3332_v4, 0.0  ;;  %v3364_v44 = vpop.permute.xlu1 %1278 }
 0x4fa   : > { %v2037_v27 = vmul.f32 1.442695, %v2036_v21  ;;  %v2226_v23 = vand.u32 2147483647, %v3341_v22  ;;  %v1468_v29 = vadd.f32 1.0, %v2908_v25  ;;  %v1471_v40 = vmul.f32 -0.5, %v2908_v25 }
 0x4fb   : > { %v2412_v32 = vpop.f32.mrb[20].mxu1  ;;  %v1268_v48 = vmul.f32 %v2904_v14, %v1267_v39  ;;  %v1062_v51 = vsel %vm1061_vm8, %v1060_v43, 0.0  ;;  %v1474_v57 = vand.u32 2147483647, %v2908_v25 }
 0x4fc   : > { %2915 = vpow2.f32 %v2037_v27  ;;  %v2227_v34 = vsub.f32 0.0, %v2226_v23  ;;  %v3345_v35 = vadd.f32 %v2412_v32, %v1181_v47  ;;  %v2792_v36 = vpop.f32.mrb[21].mxu1  ;;  %v1472_v54 = vadd.f32 1.0, %v1471_v40 }
 0x4fd   : > { %2917 = vlog2.f32 %v1468_v29  ;;  %v2910_v37 = vpop.eup %2909  ;;  %v1063_v61 = vrot.slane %v1062_v51, 4  ;;  %vm1475_vm10 = vcmp.lt.f32.partialorder %v1474_v57, 0.0004427343 }
 0x4fe   : > { %v2228_v41 = vmul.f32 1.442695, %v2227_v34  ;;  %v2416_v42 = vand.u32 2147483647, %v3345_v35  ;;  %v1658_v45 = vadd.f32 1.0, %v2910_v37  ;;  %v1661_v55 = vmul.f32 -0.5, %v2910_v37 }
 0x4ff   : > { %v1473_v2 = vmul.f32 %v2908_v25, %v1472_v54  ;;  %v1664_v33 = vand.u32 2147483647, %v2910_v37  ;;  %v1064_v12 = vadd.f32 %v1063_v61, %v1062_v51  ;;  %v850_v25 = vlaneseq }
 0x500   : > { %2919 = vpow2.f32 %v2228_v41  ;;  %v2417_v63 = vsub.f32 0.0, %v2416_v42  ;;  %v1662_v5 = vadd.f32 1.0, %v1661_v55 }
 0x501   : > { %2921 = vlog2.f32 %v1658_v45  ;;  %vm1665_vm11 = vcmp.lt.f32.partialorder %v1664_v33, 0.0004427343  ;;  %v1065_v26 = vrot.slane %v1064_v12, 2  ;;  %v1075_v45 = vshrl.u32 %v850_v25, 7 }
 0x502   : > { %v2912_v46 = vpop.eup %2911  ;;  %v2418_v49 = vmul.f32 1.442695, %v2417_v63  ;;  %v1663_v16 = vmul.f32 %v2910_v37, %v1662_v5  ;;  %v1858_v37 = vmax.f32 %v3335_v30, 0.0 }
 0x503   : > { %v2914_v47 = vpop.eup %2913  ;;  %v1265_v31 = vmul.f32 0.6931472, %v2912_v46  ;;  %v1066_v40 = vadd.f32 %v1065_v26, %v1064_v12  ;;  %v1076_v54 = vsub.s32 0, %v1075_v45  ;;  %v2429_v26 = vmax.f32 %v3345_v35, 0.0 }
 0x504   : > { %v1849_v1 = vadd.f32 1.0, %v2914_v47  ;;  %2923 = vpow2.f32 %v2418_v49  ;;  %v1852_v6 = vmul.f32 -0.5, %v2914_v47  ;;  %v1855_v19 = vand.u32 2147483647, %v2914_v47 }
 0x505   : > { %v1271_v53 = vsel %vm1270_vm9, %v1268_v48, %v1265_v31  ;;  %v2048_v49 = vmax.f32 %v3338_v15, 0.0  ;;  %v1067_v61 = vrot.slane %v1066_v40, 1 }
 0x506   : > { %v1273_v56 = vadd.f32 %v1272_v52, %v1271_v53  ;;  %2925 = vlog2.f32 %v1849_v1  ;;  %v2916_v58 = vpop.eup %2915  ;;  %v1853_v11 = vadd.f32 1.0, %v1852_v6  ;;  %vm1856_vm12 = vcmp.lt.f32.partialorder %v1855_v19, 0.0004427343 }
 0x507   : > { %v2918_v60 = vpop.eup %2917  ;;  %v2039_v62 = vadd.f32 1.0, %v2916_v58  ;;  %v2042_v17 = vmul.f32 -0.5, %v2916_v58  ;;  %v2045_v39 = vand.u32 2147483647, %v2916_v58 }
 0x508   : > { %2927 = vtanh.f32 %v1273_v56  ;;  %v1470_v0 = vmul.f32 0.6931472, %v2918_v60  ;;  %v1854_v29 = vmul.f32 %v2914_v47, %v1853_v11  ;;  %v1072_v60 = vpop.permute.xlu0 %1071 }
 0x509   : > { %2929 = vlog2.f32 %v2039_v62  ;;  %v2043_v32 = vadd.f32 1.0, %v2042_v17  ;;  %vm2046_vm13 = vcmp.lt.f32.partialorder %v2045_v39, 0.0004427343 }
 0x50a   : > { %v3354_v8 = vpop.eup %2919  ;;  %v1476_v9 = vsel %vm1475_vm10, %v1473_v2, %v1470_v0 }
 0x50b   : > { %v2922_v10 = vpop.eup %2921  ;;  %v1478_v13 = vadd.f32 %v1477_v7, %v1476_v9  ;;  %v2230_v14 = vadd.f32 1.0, %v3354_v8  ;;  %v2233_v34 = vmul.f32 -0.5, %v3354_v8  ;;  %v2044_v31 = vmul.f32 %v2916_v58, %v2043_v32 }
 0x50c   : > { %v1660_v3 = vmul.f32 0.6931472, %v2922_v10  ;;  %v2236_v1 = vand.u32 2147483647, %v3354_v8  ;;  %v2239_v7 = vmax.f32 %v3341_v22, 0.0  ;;  %v3377_v10 = vrot.slane %v1072_v60, %v1076_v54 }
 0x50d   : > { %2931 = vtanh.f32 %v1478_v13  ;;  %v2234_v48 = vadd.f32 1.0, %v2233_v34 }
 0x50e   : > { %v3358_v20 = vpop.eup %2923  ;;  %v1666_v21 = vsel %vm1665_vm11, %v1663_v16, %v1660_v3  ;;  %2933 = vlog2.f32 %v2230_v14  ;;  %vm2237_vm14 = vcmp.lt.f32.partialorder %v2236_v1, 0.0004427343 }
 0x50f   : > { %v1668_v27 = vadd.f32 %v1667_v18, %v1666_v21  ;;  %v2420_v23 = vadd.f32 1.0, %v3358_v20  ;;  %v2235_v62 = vmul.f32 %v3354_v8, %v2234_v48  ;;  %v2426_v33 = vand.u32 2147483647, %v3358_v20  ;;  %v1292_v21 = vpop.permute.xlu1 %1291 }
 0x510   : > { %v2926_v24 = vpop.eup %2925 }
 0x511   : > { %v1851_v28 = vmul.f32 0.6931472, %v2926_v24  ;;  %2935 = vtanh.f32 %v1668_v27  ;;  %vm2427_vm15 = vcmp.lt.f32.partialorder %v2426_v33, 0.0004427343 }
 0x512   : > { %v2928_v36 = vpop.eup %2927  ;;  %2937 = vlog2.f32 %v2420_v23  ;;  %v3385_v23 = vand.u32 127, %v850_v25 }
 0x513   : > { %v1275_v41 = vmul.f32 %v2928_v36, %v3325_v50  ;;  %v1857_v42 = vsel %vm1856_vm12, %v1854_v29, %v1851_v28  ;;  %v2930_v43 = vpop.eup %2929  ;;  %v2423_v50 = vmul.f32 -0.5, %v3358_v20 }
 0x514   : > { %v1859_v63 = vadd.f32 %v1858_v37, %v1857_v42  ;;  %v2041_v47 = vmul.f32 0.6931472, %v2930_v43  ;;  %v3390_v37 = vrot.slane %v1292_v21, %v1076_v54  ;;  %vm855_vm0 = vcmp.lt.s32.totalorder %v3385_v23, 32 }
 0x515   : > { %v1281_v46 = vmul.f32 %v3364_v44, %v1275_v41  ;;  %v2424_v5 = vadd.f32 1.0, %v2423_v50 }
 0x516   : > { %2939 = vtanh.f32 %v1859_v63  ;;  %v2047_v52 = vsel %vm2046_vm13, %v2044_v31, %v2041_v47 }
 0x517   : > { %v1282_v51 = vsel %vm1061_vm8, %v1281_v46, 0.0  ;;  %v2932_v53 = vpop.eup %2931  ;;  %v2049_v56 = vadd.f32 %v2048_v49, %v2047_v52  ;;  %v2425_v19 = vmul.f32 %v3358_v20, %v2424_v5 }
 0x518   : > { %v1283_v55 = vrot.slane %v1282_v51, 4  ;;  %v2934_v57 = vpop.eup %2933  ;;  %v1480_v58 = vmul.f32 %v2932_v53, %v3329_v59  ;;  %v1068_v59 = vadd.f32 %v1067_v61, %v1066_v40 }
 0x519   : > { %2941 = vtanh.f32 %v2049_v56  ;;  %v2232_v2 = vmul.f32 0.6931472, %v2934_v57 }
 0x51a   : > { %v1284_v0 = vadd.f32 %v1283_v55, %v1282_v51  ;;  %v1481_v6 = vmul.f32 %v1480_v58, %v3347_v38  ;;  %v1078_v32 = vadd.f32 %v3377_v10, %v1068_v59 }
 0x51b   : > { %v2936_v9 = vpop.eup %2935  ;;  %v2238_v13 = vsel %vm2237_vm14, %v2235_v62, %v2232_v2 }
 0x51c   : > { %v1285_v12 = vrot.slane %v1284_v0, 2  ;;  %v2938_v14 = vpop.eup %2937  ;;  %v1482_v8 = vsel %vm1061_vm8, %v1481_v6, 0.0  ;;  %v1670_v3 = vmul.f32 %v2936_v9, %v3332_v4  ;;  %v2240_v16 = vadd.f32 %v2239_v7, %v2238_v13 }
 0x51d   : > { %v1483_v17 = vrot.slane %v1482_v8, 4  ;;  %v2422_v18 = vmul.f32 0.6931472, %v2938_v14  ;;  %v2560_v46 = vclamps-f32 %v1078_v32, 1.0 }
 0x51e   : > { %v1286_v11 = vadd.f32 %v1285_v12, %v1284_v0  ;;  %v1671_v24 = vmul.f32 %v1670_v3, %v3364_v44  ;;  %2943 = vtanh.f32 %v2240_v16 }
 0x51f   : > { %v1484_v29 = vadd.f32 %v1483_v17, %v1482_v8  ;;  %v2428_v4 = vsel %vm2427_vm15, %v2425_v19, %v2422_v18 }
 0x520   : > { %v2940_v27 = vpop.eup %2939  ;;  %v1287_v28 = vrot.slane %v1286_v11, 1  ;;  %v1672_v34 = vsel %vm1061_vm8, %v1671_v24, 0.0  ;;  %v2430_v36 = vadd.f32 %v2429_v26, %v2428_v4 }
 0x521   : > { %v1861_v20 = vmul.f32 %v2940_v27, %v3335_v30  ;;  %v1485_v41 = vrot.slane %v1484_v29, 2  ;;  %v1673_v42 = vrot.slane %v1672_v34, 4 }
 0x522   : > { %v1288_v39 = vadd.f32 %v1287_v28, %v1286_v11  ;;  %2945 = vtanh.f32 %v2430_v36 }
 0x523   : > { %v1862_v43 = vmul.f32 %v1861_v20, %v3347_v38  ;;  %v2942_v25 = vpop.eup %2941  ;;  %v1486_v40 = vadd.f32 %v1485_v41, %v1484_v29  ;;  %v1674_v63 = vadd.f32 %v1673_v42, %v1672_v34 }
 0x524   : > { %v1298_v45 = vadd.f32 %v3390_v37, %v1288_v39  ;;  %v2051_v30 = vmul.f32 %v2942_v25, %v3338_v15 }
 0x525   : > { %v1863_v47 = vsel %vm1061_vm8, %v1862_v43, 0.0  ;;  %v1487_v48 = vrot.slane %v1486_v40, 1  ;;  %v1675_v49 = vrot.slane %v1674_v63, 2 }
 0x526   : > { %v2564_v31 = vclamps-f32 %v1298_v45, 1.0  ;;  %v1864_v50 = vrot.slane %v1863_v47, 4  ;;  %v2052_v51 = vmul.f32 %v2051_v30, %v3364_v44 }
 0x527   : > { %v1488_v1 = vadd.f32 %v1487_v48, %v1486_v40  ;;  %v1676_v53 = vadd.f32 %v1675_v49, %v1674_v63 }
 0x528   : > { %v1301_v52 = vsel %vm855_vm0, %v2560_v46, %v2564_v31  ;;  %v1865_v54 = vadd.f32 %v1864_v50, %v1863_v47  ;;  %v2944_v55 = vpop.eup %2943  ;;  %v2053_v56 = vsel %vm1061_vm8, %v2052_v51, 0.0 }
 0x529   : > { %v1677_v57 = vrot.slane %v1676_v53, 1  ;;  %v2054_v61 = vrot.slane %v2053_v56, 4  ;;  %v1489_v15 = vadd.f32 %v1488_v1, %v3377_v10  ;;  %v2242_v58 = vmul.f32 %v2944_v55, %v3341_v22 }
 0x52a   : > { %v1866_v60 = vrot.slane %v1865_v54, 2 }
 0x52b   : > { %v1678_v62 = vadd.f32 %v1677_v57, %v1676_v53  ;;  %v2055_v2 = vadd.f32 %v2054_v61, %v2053_v56  ;;  %v2243_v6 = vmul.f32 %v2242_v58, %v3347_v38  ;;  %v2568_v13 = vclamps-f32 %v1489_v15, 1.0 }
 0x52c   : > { %v1867_v0 = vadd.f32 %v1866_v60, %v1865_v54  ;;  %v2946_v5 = vpop.eup %2945 }
 0x52d   : > { %v1679_v7 = vadd.f32 %v1678_v62, %v3390_v37  ;;  %v2056_v9 = vrot.slane %v2055_v2, 2  ;;  %v2432_v12 = vmul.f32 %v2946_v5, %v3345_v35  ;;  %v2244_v14 = vsel %vm1061_vm8, %v2243_v6, 0.0 }
 0x52e   : > { %v1868_v33 = vrot.slane %v1867_v0, 1  ;;  %v2245_v22 = vrot.slane %v2244_v14, 4 }
 0x52f   : > { %v2572_v59 = vclamps-f32 %v1679_v7, 1.0  ;;  %v2057_v3 = vadd.f32 %v2056_v9, %v2055_v2  ;;  %v2433_v16 = vmul.f32 %v2432_v12, %v3364_v44 }
 0x530   : > { %v1869_v8 = vadd.f32 %v1868_v33, %v1867_v0  ;;  %v2246_v17 = vadd.f32 %v2245_v22, %v2244_v14 }
 0x531   : > { %v1682_v11 = vsel %vm855_vm0, %v2568_v13, %v2572_v59  ;;  %v2058_v38 = vrot.slane %v2057_v3, 1  ;;  %v2434_v19 = vsel %vm1061_vm8, %v2433_v16, 0.0 }
 0x532   : > { %v2446_v18 = vsel %vm2445_vm1, %v1301_v52, %v1682_v11  ;;  %v1870_v35 = vadd.f32 %v1869_v8, %v3377_v10  ;;  %v2247_v24 = vrot.slane %v2246_v17, 2  ;;  %v2435_v26 = vrot.slane %v2434_v19, 4 }
 0x533   : > { %v2059_v21 = vadd.f32 %v2058_v38, %v2057_v3 }
 0x534   : > { %v2248_v28 = vadd.f32 %v2247_v24, %v2246_v17  ;;  %v2436_v29 = vadd.f32 %v2435_v26, %v2434_v19  ;;  %v2576_v44 = vclamps-f32 %v1870_v35, 1.0 }
 0x535   : > { %v2060_v27 = vadd.f32 %v2059_v21, %v3390_v37 }
 0x536   : > { %v2249_v32 = vrot.slane %v2248_v28, 1  ;;  %v2437_v34 = vrot.slane %v2436_v29, 2 }
 0x537   : > { %v2580_v4 = vclamps-f32 %v2060_v27, 1.0 }
 0x538   : > { %v2250_v36 = vadd.f32 %v2249_v32, %v2248_v28  ;;  %v2438_v39 = vadd.f32 %v2437_v34, %v2436_v29 }
 0x539   : > { %v2063_v20 = vsel %vm855_vm0, %v2576_v44, %v2580_v4 }
 0x53a   : > { %v2448_v41 = vsel %vm2447_vm2, %v2446_v18, %v2063_v20  ;;  %v2439_v42 = vrot.slane %v2438_v39, 1  ;;  %v2251_v43 = vadd.f32 %v2250_v36, %v3377_v10 }
 0x53c   : > { %v2440_v25 = vadd.f32 %v2439_v42, %v2438_v39  ;;  %v2584_v40 = vclamps-f32 %v2251_v43, 1.0 }
 0x53e   : > { %v2441_v45 = vadd.f32 %v2440_v25, %v3390_v37 }
 0x540   : > { %v2588_v63 = vclamps-f32 %v2441_v45, 1.0 }
 0x542   : > { %v2444_v46 = vsel %vm855_vm0, %v2584_v40, %v2588_v63 }
 0x543   : > { %v2450_v47 = vsel %vm2449_vm3, %v2448_v41, %v2444_v46 }
 0x544   : > { %2451 = vst.msk [vmem:[%s415_s14] sm:$0xf] %vm935_vm4, %v2450_v47 }
 0x545 PF: > { %s21_s19 = sadd.s32 1, %s2969_s19   ;;  %s3445_s17 = smov %s2965_s18 }
 0x546   : > { %p18_p5 = scmp.ge.s32.totalorder %s21_s19, 4   ;;  %s3446_s18 = smov %s3448_s20 }
 0x548   :  { %20 = sbr.rel (!%p18_p5) target bundleno = 2 (0x2), region = 100 }

</bundles_post_ra>
